<compile_context>
chip_gen: v6e
topology: v6e:2x2x1
jax: 0.10.0
libtpu: 0.0.40
codegen_flags: <defaults>
</compile_context>

<pallas_src>
import functools
import math

import jax
import jax.numpy as jnp
from jax.experimental import pallas as pl
from jax.experimental.pallas import tpu as pltpu

NEG_INF = -1e30       # additive-mask "minus infinity" (finite -> NaN-free)
LN_EPS = 1e-5         # PyTorch LayerNorm default


def _pick_tile(n, candidates=(512, 256, 128, 64, 32, 16, 8)):
    """Largest candidate that evenly divides n, else n (full extent)."""
    for c in candidates:
        if n >= c and n % c == 0:
            return c
    return n


# --------------------------------------------------------------------------
# Embedding gather + positional encoding (scalar-prefetch, P2 pattern)
# --------------------------------------------------------------------------

def _embed_pe_kernel(ids_ref, pos_ref, emb_ref, pe_ref, o_ref):
    del ids_ref, pos_ref  # consumed by the index_maps
    o_ref[...] = emb_ref[...] + pe_ref[...]


def embed_with_pe(tokens, emb_table, pe):
    """tokens: [B, S] int32 -> [B, S, D].  Row gather from the embedding
    table + PE row, both selected via data-dependent index_maps (no one-hot
    matmul, table never fully resident)."""
    B, S = tokens.shape
    V, D = emb_table.shape
    M = B * S
    ids = tokens.reshape(M).astype(jnp.int32)
    pos = jnp.tile(jnp.arange(S, dtype=jnp.int32), B)
    emb3 = emb_table.reshape(V, 1, D)
    pe3 = pe.reshape(-1, 1, D)

    out = pl.pallas_call(
        _embed_pe_kernel,
        out_shape=jax.ShapeDtypeStruct((M, 1, D), jnp.float32),
        grid_spec=pltpu.PrefetchScalarGridSpec(
            num_scalar_prefetch=2,
            grid=(M,),
            in_specs=[
                pl.BlockSpec((1, 1, D), lambda i, ids, pos: (ids[i], 0, 0)),
                pl.BlockSpec((1, 1, D), lambda i, ids, pos: (pos[i], 0, 0)),
            ],
            out_specs=pl.BlockSpec((1, 1, D), lambda i, ids, pos: (i, 0, 0)),
        ),
        compiler_params=pltpu.CompilerParams(
            dimension_semantics=("arbitrary",)),
    )(ids, pos, emb3, pe3)
    return out.reshape(B, S, D)


# --------------------------------------------------------------------------
# Fused multi-head-attention sub-layer:
#   LayerNorm(x_q + OutProj(MultiHeadAttention(x_q, x_kv, x_kv)))
# Heads live inside the kernel (head-split weights); grid over batch.
# --------------------------------------------------------------------------

def _mha_block_kernel(xq_ref, xkv_ref, wq_ref, wk_ref, wv_ref, wo_ref,
                      bq_ref, bk_ref, bv_ref, bo_ref,
                      mask_ref, g_ref, beta_ref, o_ref, *, nhead, scale):
    xq = xq_ref[0]            # [Sq, D]
    xkv = xkv_ref[0]          # [Sk, D]
    mask = mask_ref[0]        # [Sq, Sk] additive
    Sq, D = xq.shape

    attn = jnp.zeros((Sq, D), jnp.float32)
    for h in range(nhead):    # static unrolled head loop (no lane slicing)
        qh = jnp.dot(xq, wq_ref[h], preferred_element_type=jnp.float32) + bq_ref[h]
        kh = jnp.dot(xkv, wk_ref[h], preferred_element_type=jnp.float32) + bk_ref[h]
        vh = jnp.dot(xkv, wv_ref[h], preferred_element_type=jnp.float32) + bv_ref[h]
        # scores: q @ k^T without an explicit transpose (NT contraction)
        s = jax.lax.dot_general(qh, kh, (((1,), (1,)), ((), ())),
                                preferred_element_type=jnp.float32)
        s = s * scale + mask
        s = s - jnp.max(s, axis=-1, keepdims=True)
        p = jnp.exp(s)
        p = p * pl.reciprocal(jnp.sum(p, axis=-1, keepdims=True), approx=True)
        ctx = jnp.dot(p, vh, preferred_element_type=jnp.float32)      # [Sq, Dh]
        # per-head slice of the output projection, accumulated in place
        attn = attn + jnp.dot(ctx, wo_ref[h], preferred_element_type=jnp.float32)

    y = xq + attn + bo_ref[...]                       # residual + out-proj bias
    mean = jnp.mean(y, axis=-1, keepdims=True)
    var = jnp.mean((y - mean) ** 2, axis=-1, keepdims=True)
    o_ref[0] = (y - mean) * jax.lax.rsqrt(var + LN_EPS) * g_ref[...] + beta_ref[...]


def mha_block(xq, xkv, mask, p, ln_g, ln_b, nhead):
    """xq: [B, Sq, D], xkv: [B, Sk, D], mask: [B, Sq, Sk] additive."""
    B, Sq, D = xq.shape
    Sk = xkv.shape[1]
    Dh = D // nhead
    scale = 1.0 / math.sqrt(Dh)

    def full(*shape):
        return pl.BlockSpec(shape, lambda b: (0,) * len(shape))

    return pl.pallas_call(
        functools.partial(_mha_block_kernel, nhead=nhead, scale=scale),
        out_shape=jax.ShapeDtypeStruct((B, Sq, D), jnp.float32),
        grid=(B,),
        in_specs=[
            pl.BlockSpec((1, Sq, D), lambda b: (b, 0, 0)),   # query source
            pl.BlockSpec((1, Sk, D), lambda b: (b, 0, 0)),   # key/value source
            full(nhead, D, Dh),                              # wq (head-split)
            full(nhead, D, Dh),                              # wk
            full(nhead, D, Dh),                              # wv
            full(nhead, Dh, D),                              # wo (head-split rows)
            full(nhead, 1, Dh),                              # bq
            full(nhead, 1, Dh),                              # bk
            full(nhead, 1, Dh),                              # bv
            full(1, D),                                      # bo
            pl.BlockSpec((1, Sq, Sk), lambda b: (b, 0, 0)),  # mask (shared by heads)
            full(1, D),                                      # LN gamma
            full(1, D),                                      # LN beta
        ],
        out_specs=pl.BlockSpec((1, Sq, D), lambda b: (b, 0, 0)),
        compiler_params=pltpu.CompilerParams(
            dimension_semantics=("parallel",)),
    )(xq, xkv,
      p["wq_h"], p["wk_h"], p["wv_h"], p["wo_h"],
      p["bq_h"], p["bk_h"], p["bv_h"], p["bo"].reshape(1, D),
      mask, ln_g.reshape(1, D), ln_b.reshape(1, D))


# --------------------------------------------------------------------------
# Fused feed-forward sub-layer: LayerNorm(h + W2(relu(W1 h + b1)) + b2)
# --------------------------------------------------------------------------

def _ffn_block_kernel(h_ref, w1_ref, b1_ref, w2_ref, b2_ref,
                      g_ref, beta_ref, o_ref):
    h = h_ref[...]                                             # [tm, D]
    f = jnp.dot(h, w1_ref[...], preferred_element_type=jnp.float32) + b1_ref[...]
    f = jnp.maximum(f, 0.0)
    f = jnp.dot(f, w2_ref[...], preferred_element_type=jnp.float32) + b2_ref[...]
    y = h + f
    mean = jnp.mean(y, axis=-1, keepdims=True)
    var = jnp.mean((y - mean) ** 2, axis=-1, keepdims=True)
    o_ref[...] = (y - mean) * jax.lax.rsqrt(var + LN_EPS) * g_ref[...] + beta_ref[...]


def ffn_block(x, w1, b1, w2, b2, ln_g, ln_b):
    B, S, D = x.shape
    M = B * S
    F = w1.shape[1]
    tm = _pick_tile(M)
    out = pl.pallas_call(
        _ffn_block_kernel,
        out_shape=jax.ShapeDtypeStruct((M, D), jnp.float32),
        grid=(M // tm,),
        in_specs=[
            pl.BlockSpec((tm, D), lambda i: (i, 0)),
            pl.BlockSpec((D, F), lambda i: (0, 0)),
            pl.BlockSpec((1, F), lambda i: (0, 0)),
            pl.BlockSpec((F, D), lambda i: (0, 0)),
            pl.BlockSpec((1, D), lambda i: (0, 0)),
            pl.BlockSpec((1, D), lambda i: (0, 0)),
            pl.BlockSpec((1, D), lambda i: (0, 0)),
        ],
        out_specs=pl.BlockSpec((tm, D), lambda i: (i, 0)),
        compiler_params=pltpu.CompilerParams(
            dimension_semantics=("parallel",)),
    )(x.reshape(M, D), w1, b1.reshape(1, F), w2, b2.reshape(1, D),
      ln_g.reshape(1, D), ln_b.reshape(1, D))
    return out.reshape(B, S, D)


# --------------------------------------------------------------------------
# Tiled output projection (vocab logits)
# --------------------------------------------------------------------------

def _linear_kernel(x_ref, w_ref, b_ref, o_ref):
    o_ref[...] = jnp.dot(x_ref[...], w_ref[...],
                         preferred_element_type=jnp.float32) + b_ref[...]


def linear(x, w, b):
    """x: [M, K] @ w: [K, N] + b[N] -> [M, N], M/N tiled, both parallel."""
    M, K = x.shape
    N = w.shape[1]
    tm = _pick_tile(M)
    tn = _pick_tile(N, (2048, 1024, 512, 256, 128))
    return pl.pallas_call(
        _linear_kernel,
        out_shape=jax.ShapeDtypeStruct((M, N), jnp.float32),
        grid=(M // tm, N // tn),
        in_specs=[
            pl.BlockSpec((tm, K), lambda i, j: (i, 0)),
            pl.BlockSpec((K, tn), lambda i, j: (0, j)),
            pl.BlockSpec((1, tn), lambda i, j: (0, j)),
        ],
        out_specs=pl.BlockSpec((tm, tn), lambda i, j: (i, j)),
        compiler_params=pltpu.CompilerParams(
            dimension_semantics=("parallel", "parallel")),
    )(x, w, b.reshape(1, N))


# --------------------------------------------------------------------------
# Model glue (masks, layer stacking) in plain JAX
# --------------------------------------------------------------------------

def causal_additive_mask(sz):
    # matches _generate_square_subsequent_mask: 0 on/below diag, -inf above
    return jnp.where(jnp.tril(jnp.ones((sz, sz), jnp.bool_)),
                     0.0, NEG_INF).astype(jnp.float32)


def padding_additive_mask(tokens, pad_idx):
    return jnp.where(tokens == pad_idx, NEG_INF, 0.0).astype(jnp.float32)


def make_positional_encoding(max_len, d_model):
    position = jnp.arange(max_len, dtype=jnp.float32)[:, None]
    div_term = jnp.exp(jnp.arange(0, d_model, 2, dtype=jnp.float32)
                       * (-math.log(10000.0) / d_model))
    pe = jnp.zeros((max_len, d_model), jnp.float32)
    pe = pe.at[:, 0::2].set(jnp.sin(position * div_term))
    pe = pe.at[:, 1::2].set(jnp.cos(position * div_term))
    return pe


def encoder_layer(x, attn_mask, p, nhead):
    h = mha_block(x, x, attn_mask, p["self_attn"], p["ln1_g"], p["ln1_b"], nhead)
    return ffn_block(h, p["ff_w1"], p["ff_b1"], p["ff_w2"], p["ff_b2"],
                     p["ln2_g"], p["ln2_b"])


def decoder_layer(x, memory, self_mask, cross_mask, p, nhead):
    h = mha_block(x, x, self_mask, p["self_attn"], p["ln1_g"], p["ln1_b"], nhead)
    h = mha_block(h, memory, cross_mask, p["cross_attn"], p["ln2_g"], p["ln2_b"], nhead)
    return ffn_block(h, p["ff_w1"], p["ff_b1"], p["ff_w2"], p["ff_b2"],
                     p["ln3_g"], p["ln3_b"])


def seq2seq_transformer_forward(params, src, tgt, *, nhead, pad_idx):
    """src: [B, S_src] int32, tgt: [B, S_tgt] int32 -> logits [B, S_tgt, V]."""
    B, S_src = src.shape
    _, S_tgt = tgt.shape

    # The PyTorch forward applies a *causal* mask to the encoder as well
    # (src_mask defaults to the square-subsequent mask), plus key-padding masks.
    src_pad = padding_additive_mask(src, pad_idx)                          # [B, S_src]
    tgt_pad = padding_additive_mask(tgt, pad_idx)                          # [B, S_tgt]
    enc_mask = causal_additive_mask(S_src)[None] + src_pad[:, None, :]     # [B,S_src,S_src]
    dec_self_mask = causal_additive_mask(S_tgt)[None] + tgt_pad[:, None, :]
    dec_cross_mask = jnp.broadcast_to(src_pad[:, None, :], (B, S_tgt, S_src))

    src_emb = embed_with_pe(src, params["embedding"], params["pe"])
    tgt_emb = embed_with_pe(tgt, params["embedding"], params["pe"])

    memory = src_emb
    for lp in params["encoder_layers"]:
        memory = encoder_layer(memory, enc_mask, lp, nhead)

    out = tgt_emb
    for lp in params["decoder_layers"]:
        out = decoder_layer(out, memory, dec_self_mask, dec_cross_mask, lp, nhead)

    D = out.shape[-1]
    V = params["out_w"].shape[1]
    logits = linear(out.reshape(B * S_tgt, D), params["out_w"], params["out_b"])
    return logits.reshape(B, S_tgt, V)


# --------------------------------------------------------------------------
# Deterministic parameter initialization (xavier-uniform like the module),
# with attention weights stored pre-split per head: wq/wk/wv: [H, D, Dh],
# wo: [H, Dh, D]  (mathematically identical to the fused [D, D] matrices).
# --------------------------------------------------------------------------

def _xavier(key, shape):
    bound = math.sqrt(6.0 / (shape[0] + shape[1]))
    return jax.random.uniform(key, shape, jnp.float32, -bound, bound)


def init_params(key, vocab_size, d_model, nhead, n_enc, n_dec, d_ff, max_len):
    keys = iter(jax.random.split(key, 1024))
    Dh = d_model // nhead

    def split_in(w):   # [D, D] -> [H, D, Dh]  (column blocks per head)
        return w.reshape(d_model, nhead, Dh).transpose(1, 0, 2)

    def mha_p():
        return dict(
            wq_h=split_in(_xavier(next(keys), (d_model, d_model))),
            wk_h=split_in(_xavier(next(keys), (d_model, d_model))),
            wv_h=split_in(_xavier(next(keys), (d_model, d_model))),
            wo_h=_xavier(next(keys), (d_model, d_model)).reshape(nhead, Dh, d_model),
            bq_h=jnp.zeros((nhead, 1, Dh), jnp.float32),
            bk_h=jnp.zeros((nhead, 1, Dh), jnp.float32),
            bv_h=jnp.zeros((nhead, 1, Dh), jnp.float32),
            bo=jnp.zeros((d_model,), jnp.float32),
        )

    def enc_layer_p():
        return dict(
            self_attn=mha_p(),
            ff_w1=_xavier(next(keys), (d_model, d_ff)), ff_b1=jnp.zeros((d_ff,), jnp.float32),
            ff_w2=_xavier(next(keys), (d_ff, d_model)), ff_b2=jnp.zeros((d_model,), jnp.float32),
            ln1_g=jnp.ones((d_model,), jnp.float32), ln1_b=jnp.zeros((d_model,), jnp.float32),
            ln2_g=jnp.ones((d_model,), jnp.float32), ln2_b=jnp.zeros((d_model,), jnp.float32),
        )

    def dec_layer_p():
        p = enc_layer_p()
        p["cross_attn"] = mha_p()
        p["ln3_g"] = jnp.ones((d_model,), jnp.float32)
        p["ln3_b"] = jnp.zeros((d_model,), jnp.float32)
        return p

    return dict(
        embedding=_xavier(next(keys), (vocab_size, d_model)),
        pe=make_positional_encoding(max_len, d_model),
        encoder_layers=[enc_layer_p() for _ in range(n_enc)],
        decoder_layers=[dec_layer_p() for _ in range(n_dec)],
        out_w=_xavier(next(keys), (d_model, vocab_size)),
        out_b=jnp.zeros((vocab_size,), jnp.float32),
    )


# --------------------------------------------------------------------------

if __name__ == "__main__":
    # small but lane-dense config (d_model and vocab multiples of 128)
    vocab_size = 128
    d_model = 128
    nhead = 4
    num_encoder_layers = 2
    num_decoder_layers = 2
    dim_feedforward = 256
    max_seq_length = 64
    pad_idx = 0
    B, S_src, S_tgt = 2, 8, 8

    key = jax.random.PRNGKey(0)
    pkey, skey, tkey = jax.random.split(key, 3)
    params = init_params(pkey, vocab_size, d_model, nhead,
                         num_encoder_layers, num_decoder_layers,
                         dim_feedforward, max_seq_length)

    # tokens in [1, vocab) so no key row is fully masked (pad + causal)
    src = jax.random.randint(skey, (B, S_src), 1, vocab_size, dtype=jnp.int32)
    tgt = jax.random.randint(tkey, (B, S_tgt), 1, vocab_size, dtype=jnp.int32)

    fwd = jax.jit(functools.partial(seq2seq_transformer_forward,
                                    nhead=nhead, pad_idx=pad_idx))
    logits = fwd(params, src, tgt)
    jax.block_until_ready(logits)

    assert logits.shape == (B, S_tgt, vocab_size)
    assert bool(jnp.all(jnp.isfinite(logits)))
    print("KERNEL_OK")
</pallas_src>

<mosaic_0001>
module attributes {stable_mosaic.version = 11 : i64} {
  func.func @_embed_pe_kernel(%arg0: i32, %arg1: memref<16xi32, #tpu.memory_space<smem>>, %arg2: memref<16xi32, #tpu.memory_space<smem>>, %arg3: memref<1x1x128xf32, #tpu.memory_space<vmem>>, %arg4: memref<1x1x128xf32, #tpu.memory_space<vmem>>, %arg5: memref<1x1x128xf32, #tpu.memory_space<vmem>>) attributes {dimension_semantics = [#tpu.dimension_semantics<arbitrary>], iteration_bounds = array<i64: 16>, scalar_prefetch = 2 : i64, scratch_operands = 0 : i64, tpu.core_type = #tpu.core_type<tc>, window_params = [{transform_indices = @transform_0, window_bounds = array<i64: 1, 1, 128>}, {transform_indices = @transform_1, window_bounds = array<i64: 1, 1, 128>}, {transform_indices = @transform_2, window_bounds = array<i64: 1, 1, 128>}]} {
    %c0 = arith.constant 0 : index
    %c0_0 = arith.constant 0 : index
    %c0_1 = arith.constant 0 : index
    %0 = vector.load %arg3[%c0, %c0_0, %c0_1] : memref<1x1x128xf32, #tpu.memory_space<vmem>>, vector<1x1x128xf32>
    %c0_2 = arith.constant 0 : index
    %c0_3 = arith.constant 0 : index
    %c0_4 = arith.constant 0 : index
    %1 = vector.load %arg4[%c0_2, %c0_3, %c0_4] : memref<1x1x128xf32, #tpu.memory_space<vmem>>, vector<1x1x128xf32>
    %2 = arith.addf %0, %1 : vector<1x1x128xf32>
    %c0_5 = arith.constant 0 : index
    %c0_6 = arith.constant 0 : index
    %c0_7 = arith.constant 0 : index
    %3 = vector.load %arg5[%c0_5, %c0_6, %c0_7] : memref<1x1x128xf32, #tpu.memory_space<vmem>>, vector<1x1x128xf32>
    tpu.vector_store %arg5[%c0_5, %c0_6, %c0_7], %2 {strides = array<i32>} : memref<1x1x128xf32, #tpu.memory_space<vmem>>, vector<1x1x128xf32>,
    return
  }
  func.func @transform_0(%arg0: i32, %arg1: memref<16xi32, #tpu.memory_space<smem>>, %arg2: memref<16xi32, #tpu.memory_space<smem>>) -> (i32, i32, i32) {
    %0 = arith.index_cast %arg0 : i32 to index
    %1 = memref.load %arg1[%0] : memref<16xi32, #tpu.memory_space<smem>>
    %c0_i32 = arith.constant 0 : i32
    %c0_i32_0 = arith.constant 0 : i32
    %c0_i32_1 = arith.constant 0 : i32
    return %1, %c0_i32, %c0_i32_0 : i32, i32, i32
  }
  func.func @transform_1(%arg0: i32, %arg1: memref<16xi32, #tpu.memory_space<smem>>, %arg2: memref<16xi32, #tpu.memory_space<smem>>) -> (i32, i32, i32) {
    %0 = arith.index_cast %arg0 : i32 to index
    %1 = memref.load %arg2[%0] : memref<16xi32, #tpu.memory_space<smem>>
    %c0_i32 = arith.constant 0 : i32
    %c0_i32_0 = arith.constant 0 : i32
    %c0_i32_1 = arith.constant 0 : i32
    return %1, %c0_i32, %c0_i32_0 : i32, i32, i32
  }
  func.func @transform_2(%arg0: i32, %arg1: memref<16xi32, #tpu.memory_space<smem>>, %arg2: memref<16xi32, #tpu.memory_space<smem>>) -> (i32, i32, i32) {
    %c0_i32 = arith.constant 0 : i32
    %c0_i32_0 = arith.constant 0 : i32
    %c0_i32_1 = arith.constant 0 : i32
    return %arg0, %c0_i32, %c0_i32_0 : i32, i32, i32
  }
}

module attributes {stable_mosaic.version = 11 : i64} {
  func.func @_ffn_block_kernel(%arg0: i32, %arg1: memref<16x128xf32, #tpu.memory_space<vmem>>, %arg2: memref<128x256xf32, #tpu.memory_space<vmem>>, %arg3: memref<1x256xf32, #tpu.memory_space<vmem>>, %arg4: memref<256x128xf32, #tpu.memory_space<vmem>>, %arg5: memref<1x128xf32, #tpu.memory_space<vmem>>, %arg6: memref<1x128xf32, #tpu.memory_space<vmem>>, %arg7: memref<1x128xf32, #tpu.memory_space<vmem>>, %arg8: memref<16x128xf32, #tpu.memory_space<vmem>>) attributes {dimension_semantics = [#tpu.dimension_semantics<parallel>], iteration_bounds = array<i64: 1>, scalar_prefetch = 0 : i64, scratch_operands = 0 : i64, tpu.core_type = #tpu.core_type<tc>, window_params = [{transform_indices = @transform_0, window_bounds = array<i64: 16, 128>}, {pipeline_mode = #tpu.pipeline_mode<synchronous>, transform_indices = @transform_1, window_bounds = array<i64: 128, 256>}, {pipeline_mode = #tpu.pipeline_mode<synchronous>, transform_indices = @transform_2, window_bounds = array<i64: 1, 256>}, {pipeline_mode = #tpu.pipeline_mode<synchronous>, transform_indices = @transform_3, window_bounds = array<i64: 256, 128>}, {pipeline_mode = #tpu.pipeline_mode<synchronous>, transform_indices = @transform_4, window_bounds = array<i64: 1, 128>}, {pipeline_mode = #tpu.pipeline_mode<synchronous>, transform_indices = @transform_5, window_bounds = array<i64: 1, 128>}, {pipeline_mode = #tpu.pipeline_mode<synchronous>, transform_indices = @transform_6, window_bounds = array<i64: 1, 128>}, {transform_indices = @transform_7, window_bounds = array<i64: 16, 128>}]} {
    %c0 = arith.constant 0 : index
    %c0_0 = arith.constant 0 : index
    %0 = vector.load %arg1[%c0, %c0_0] : memref<16x128xf32, #tpu.memory_space<vmem>>, vector<16x128xf32>
    %c0_1 = arith.constant 0 : index
    %c0_2 = arith.constant 0 : index
    %1 = vector.load %arg2[%c0_1, %c0_2] : memref<128x256xf32, #tpu.memory_space<vmem>>, vector<128x256xf32>
    %cst = arith.constant dense<0.000000e+00> : vector<16x256xf32>
    %2 = tpu.matmul %0, %1, %cst {dimension_numbers = #tpu.dot_dimension_numbers<[1], [0], [0], [1], [0, 0, 1, 1], [], []>} : vector<16x128xf32>, vector<128x256xf32>, vector<16x256xf32> -> vector<16x256xf32>
    %c0_3 = arith.constant 0 : index
    %c0_4 = arith.constant 0 : index
    %3 = vector.load %arg3[%c0_3, %c0_4] : memref<1x256xf32, #tpu.memory_space<vmem>>, vector<1x256xf32>
    %4 = vector.broadcast %3 : vector<1x256xf32> to vector<16x256xf32>
    %5 = arith.addf %2, %4 : vector<16x256xf32>
    %cst_5 = arith.constant 0.000000e+00 : f32
    %6 = vector.broadcast %cst_5 : f32 to vector<16x256xf32>
    %7 = arith.maximumf %5, %6 : vector<16x256xf32>
    %c0_6 = arith.constant 0 : index
    %c0_7 = arith.constant 0 : index
    %8 = vector.load %arg4[%c0_6, %c0_7] : memref<256x128xf32, #tpu.memory_space<vmem>>, vector<256x128xf32>
    %cst_8 = arith.constant dense<0.000000e+00> : vector<16x128xf32>
    %9 = tpu.matmul %7, %8, %cst_8 {dimension_numbers = #tpu.dot_dimension_numbers<[1], [0], [0], [1], [0, 0, 1, 1], [], []>} : vector<16x256xf32>, vector<256x128xf32>, vector<16x128xf32> -> vector<16x128xf32>
    %c0_9 = arith.constant 0 : index
    %c0_10 = arith.constant 0 : index
    %10 = vector.load %arg5[%c0_9, %c0_10] : memref<1x128xf32, #tpu.memory_space<vmem>>, vector<1x128xf32>
    %11 = vector.broadcast %10 : vector<1x128xf32> to vector<16x128xf32>
    %12 = arith.addf %9, %11 : vector<16x128xf32>
    %13 = arith.addf %0, %12 : vector<16x128xf32>
    %cst_11 = arith.constant dense<0.000000e+00> : vector<16xf32>
    %14 = vector.multi_reduction <add>, %13, %cst_11 [1] : vector<16x128xf32> to vector<16xf32>
    %15 = vector.shape_cast %14 : vector<16xf32> to vector<16x1xf32>
    %cst_12 = arith.constant 1.280000e+02 : f32
    %16 = vector.broadcast %cst_12 : f32 to vector<16x1xf32>
    %17 = arith.divf %15, %16 : vector<16x1xf32>
    %18 = vector.broadcast %17 : vector<16x1xf32> to vector<16x128xf32>
    %19 = arith.subf %13, %18 : vector<16x128xf32>
    %20 = arith.mulf %19, %19 : vector<16x128xf32>
    %cst_13 = arith.constant dense<0.000000e+00> : vector<16xf32>
    %21 = vector.multi_reduction <add>, %20, %cst_13 [1] : vector<16x128xf32> to vector<16xf32>
    %22 = vector.shape_cast %21 : vector<16xf32> to vector<16x1xf32>
    %cst_14 = arith.constant 1.280000e+02 : f32
    %23 = vector.broadcast %cst_14 : f32 to vector<16x1xf32>
    %24 = arith.divf %22, %23 : vector<16x1xf32>
    %25 = vector.broadcast %17 : vector<16x1xf32> to vector<16x128xf32>
    %26 = arith.subf %13, %25 : vector<16x128xf32>
    %cst_15 = arith.constant 9.99999974E-6 : f32
    %27 = vector.broadcast %cst_15 : f32 to vector<16x1xf32>
    %28 = arith.addf %24, %27 : vector<16x1xf32>
    %29 = math.rsqrt %28 : vector<16x1xf32>
    %30 = vector.broadcast %29 : vector<16x1xf32> to vector<16x128xf32>
    %31 = arith.mulf %26, %30 : vector<16x128xf32>
    %c0_16 = arith.constant 0 : index
    %c0_17 = arith.constant 0 : index
    %32 = vector.load %arg6[%c0_16, %c0_17] : memref<1x128xf32, #tpu.memory_space<vmem>>, vector<1x128xf32>
    %33 = vector.broadcast %32 : vector<1x128xf32> to vector<16x128xf32>
    %34 = arith.mulf %31, %33 : vector<16x128xf32>
    %c0_18 = arith.constant 0 : index
    %c0_19 = arith.constant 0 : index
    %35 = vector.load %arg7[%c0_18, %c0_19] : memref<1x128xf32, #tpu.memory_space<vmem>>, vector<1x128xf32>
    %36 = vector.broadcast %35 : vector<1x128xf32> to vector<16x128xf32>
    %37 = arith.addf %34, %36 : vector<16x128xf32>
    %c0_20 = arith.constant 0 : index
    %c0_21 = arith.constant 0 : index
    %38 = vector.load %arg8[%c0_20, %c0_21] : memref<16x128xf32, #tpu.memory_space<vmem>>, vector<16x128xf32>
    tpu.vector_store %arg8[%c0_20, %c0_21], %37 {strides = array<i32>} : memref<16x128xf32, #tpu.memory_space<vmem>>, vector<16x128xf32>,
    return
  }
  func.func @transform_0(%arg0: i32) -> (i32, i32) {
    %c0_i32 = arith.constant 0 : i32
    %c0_i32_0 = arith.constant 0 : i32
    return %arg0, %c0_i32 : i32, i32
  }
  func.func @transform_1(%arg0: i32) -> (i32, i32) {
    %c0_i32 = arith.constant 0 : i32
    %c0_i32_0 = arith.constant 0 : i32
    %c0_i32_1 = arith.constant 0 : i32
    return %c0_i32, %c0_i32_0 : i32, i32
  }
  func.func @transform_2(%arg0: i32) -> (i32, i32) {
    %c0_i32 = arith.constant 0 : i32
    %c0_i32_0 = arith.constant 0 : i32
    %c0_i32_1 = arith.constant 0 : i32
    return %c0_i32, %c0_i32_0 : i32, i32
  }
  func.func @transform_3(%arg0: i32) -> (i32, i32) {
    %c0_i32 = arith.constant 0 : i32
    %c0_i32_0 = arith.constant 0 : i32
    %c0_i32_1 = arith.constant 0 : i32
    return %c0_i32, %c0_i32_0 : i32, i32
  }
  func.func @transform_4(%arg0: i32) -> (i32, i32) {
    %c0_i32 = arith.constant 0 : i32
    %c0_i32_0 = arith.constant 0 : i32
    %c0_i32_1 = arith.constant 0 : i32
    return %c0_i32, %c0_i32_0 : i32, i32
  }
  func.func @transform_5(%arg0: i32) -> (i32, i32) {
    %c0_i32 = arith.constant 0 : i32
    %c0_i32_0 = arith.constant 0 : i32
    %c0_i32_1 = arith.constant 0 : i32
    return %c0_i32, %c0_i32_0 : i32, i32
  }
  func.func @transform_6(%arg0: i32) -> (i32, i32) {
    %c0_i32 = arith.constant 0 : i32
    %c0_i32_0 = arith.constant 0 : i32
    %c0_i32_1 = arith.constant 0 : i32
    return %c0_i32, %c0_i32_0 : i32, i32
  }
  func.func @transform_7(%arg0: i32) -> (i32, i32) {
    %c0_i32 = arith.constant 0 : i32
    %c0_i32_0 = arith.constant 0 : i32
    return %arg0, %c0_i32 : i32, i32
  }
}

module attributes {stable_mosaic.version = 11 : i64} {
  func.func @_mha_block_kernel(%arg0: i32, %arg1: memref<1x8x128xf32, #tpu.memory_space<vmem>>, %arg2: memref<1x8x128xf32, #tpu.memory_space<vmem>>, %arg3: memref<4x128x32xf32, #tpu.memory_space<vmem>>, %arg4: memref<4x128x32xf32, #tpu.memory_space<vmem>>, %arg5: memref<4x128x32xf32, #tpu.memory_space<vmem>>, %arg6: memref<4x32x128xf32, #tpu.memory_space<vmem>>, %arg7: memref<4x1x32xf32, #tpu.memory_space<vmem>>, %arg8: memref<4x1x32xf32, #tpu.memory_space<vmem>>, %arg9: memref<4x1x32xf32, #tpu.memory_space<vmem>>, %arg10: memref<1x128xf32, #tpu.memory_space<vmem>>, %arg11: memref<1x8x8xf32, #tpu.memory_space<vmem>>, %arg12: memref<1x128xf32, #tpu.memory_space<vmem>>, %arg13: memref<1x128xf32, #tpu.memory_space<vmem>>, %arg14: memref<1x8x128xf32, #tpu.memory_space<vmem>>) attributes {dimension_semantics = [#tpu.dimension_semantics<parallel>], iteration_bounds = array<i64: 2>, scalar_prefetch = 0 : i64, scratch_operands = 0 : i64, tpu.core_type = #tpu.core_type<tc>, window_params = [{transform_indices = @transform_0, window_bounds = array<i64: 1, 8, 128>}, {transform_indices = @transform_1, window_bounds = array<i64: 1, 8, 128>}, {pipeline_mode = #tpu.pipeline_mode<synchronous>, transform_indices = @transform_2, window_bounds = array<i64: 4, 128, 32>}, {pipeline_mode = #tpu.pipeline_mode<synchronous>, transform_indices = @transform_3, window_bounds = array<i64: 4, 128, 32>}, {pipeline_mode = #tpu.pipeline_mode<synchronous>, transform_indices = @transform_4, window_bounds = array<i64: 4, 128, 32>}, {pipeline_mode = #tpu.pipeline_mode<synchronous>, transform_indices = @transform_5, window_bounds = array<i64: 4, 32, 128>}, {pipeline_mode = #tpu.pipeline_mode<synchronous>, transform_indices = @transform_6, window_bounds = array<i64: 4, 1, 32>}, {pipeline_mode = #tpu.pipeline_mode<synchronous>, transform_indices = @transform_7, window_bounds = array<i64: 4, 1, 32>}, {pipeline_mode = #tpu.pipeline_mode<synchronous>, transform_indices = @transform_8, window_bounds = array<i64: 4, 1, 32>}, {pipeline_mode = #tpu.pipeline_mode<synchronous>, transform_indices = @transform_9, window_bounds = array<i64: 1, 128>}, {transform_indices = @transform_10, window_bounds = array<i64: 1, 8, 8>}, {pipeline_mode = #tpu.pipeline_mode<synchronous>, transform_indices = @transform_11, window_bounds = array<i64: 1, 128>}, {pipeline_mode = #tpu.pipeline_mode<synchronous>, transform_indices = @transform_12, window_bounds = array<i64: 1, 128>}, {transform_indices = @transform_13, window_bounds = array<i64: 1, 8, 128>}]} {
    %c0 = arith.constant 0 : index
    %c0_0 = arith.constant 0 : index
    %c0_1 = arith.constant 0 : index
    %0 = vector.load %arg1[%c0, %c0_0, %c0_1] : memref<1x8x128xf32, #tpu.memory_space<vmem>>, vector<1x8x128xf32>
    %1 = vector.shape_cast %0 : vector<1x8x128xf32> to vector<8x128xf32>
    %c0_2 = arith.constant 0 : index
    %c0_3 = arith.constant 0 : index
    %c0_4 = arith.constant 0 : index
    %2 = vector.load %arg2[%c0_2, %c0_3, %c0_4] : memref<1x8x128xf32, #tpu.memory_space<vmem>>, vector<1x8x128xf32>
    %3 = vector.shape_cast %2 : vector<1x8x128xf32> to vector<8x128xf32>
    %c0_5 = arith.constant 0 : index
    %c0_6 = arith.constant 0 : index
    %c0_7 = arith.constant 0 : index
    %4 = vector.load %arg11[%c0_5, %c0_6, %c0_7] : memref<1x8x8xf32, #tpu.memory_space<vmem>>, vector<1x8x8xf32>
    %5 = vector.shape_cast %4 : vector<1x8x8xf32> to vector<8x8xf32>
    %cst = arith.constant 0.000000e+00 : f32
    %6 = vector.broadcast %cst : f32 to vector<8x128xf32>
    %c0_8 = arith.constant 0 : index
    %c0_9 = arith.constant 0 : index
    %c0_10 = arith.constant 0 : index
    %7 = vector.load %arg3[%c0_8, %c0_9, %c0_10] : memref<4x128x32xf32, #tpu.memory_space<vmem>>, vector<1x128x32xf32>
    %8 = vector.shape_cast %7 : vector<1x128x32xf32> to vector<128x32xf32>
    %cst_11 = arith.constant dense<0.000000e+00> : vector<8x32xf32>
    %9 = tpu.matmul %1, %8, %cst_11 {dimension_numbers = #tpu.dot_dimension_numbers<[1], [0], [0], [1], [0, 0, 1, 1], [], []>} : vector<8x128xf32>, vector<128x32xf32>, vector<8x32xf32> -> vector<8x32xf32>
    %c0_12 = arith.constant 0 : index
    %c0_13 = arith.constant 0 : index
    %c0_14 = arith.constant 0 : index
    %10 = vector.load %arg7[%c0_12, %c0_13, %c0_14] : memref<4x1x32xf32, #tpu.memory_space<vmem>>, vector<1x1x32xf32>
    %11 = vector.shape_cast %10 : vector<1x1x32xf32> to vector<1x32xf32>
    %12 = vector.broadcast %11 : vector<1x32xf32> to vector<8x32xf32>
    %13 = arith.addf %9, %12 : vector<8x32xf32>
    %c0_15 = arith.constant 0 : index
    %c0_16 = arith.constant 0 : index
    %c0_17 = arith.constant 0 : index
    %14 = vector.load %arg4[%c0_15, %c0_16, %c0_17] : memref<4x128x32xf32, #tpu.memory_space<vmem>>, vector<1x128x32xf32>
    %15 = vector.shape_cast %14 : vector<1x128x32xf32> to vector<128x32xf32>
    %cst_18 = arith.constant dense<0.000000e+00> : vector<8x32xf32>
    %16 = tpu.matmul %3, %15, %cst_18 {dimension_numbers = #tpu.dot_dimension_numbers<[1], [0], [0], [1], [0, 0, 1, 1], [], []>} : vector<8x128xf32>, vector<128x32xf32>, vector<8x32xf32> -> vector<8x32xf32>
    %c0_19 = arith.constant 0 : index
    %c0_20 = arith.constant 0 : index
    %c0_21 = arith.constant 0 : index
    %17 = vector.load %arg8[%c0_19, %c0_20, %c0_21] : memref<4x1x32xf32, #tpu.memory_space<vmem>>, vector<1x1x32xf32>
    %18 = vector.shape_cast %17 : vector<1x1x32xf32> to vector<1x32xf32>
    %19 = vector.broadcast %18 : vector<1x32xf32> to vector<8x32xf32>
    %20 = arith.addf %16, %19 : vector<8x32xf32>
    %c0_22 = arith.constant 0 : index
    %c0_23 = arith.constant 0 : index
    %c0_24 = arith.constant 0 : index
    %21 = vector.load %arg5[%c0_22, %c0_23, %c0_24] : memref<4x128x32xf32, #tpu.memory_space<vmem>>, vector<1x128x32xf32>
    %22 = vector.shape_cast %21 : vector<1x128x32xf32> to vector<128x32xf32>
    %cst_25 = arith.constant dense<0.000000e+00> : vector<8x32xf32>
    %23 = tpu.matmul %3, %22, %cst_25 {dimension_numbers = #tpu.dot_dimension_numbers<[1], [0], [0], [1], [0, 0, 1, 1], [], []>} : vector<8x128xf32>, vector<128x32xf32>, vector<8x32xf32> -> vector<8x32xf32>
    %c0_26 = arith.constant 0 : index
    %c0_27 = arith.constant 0 : index
    %c0_28 = arith.constant 0 : index
    %24 = vector.load %arg9[%c0_26, %c0_27, %c0_28] : memref<4x1x32xf32, #tpu.memory_space<vmem>>, vector<1x1x32xf32>
    %25 = vector.shape_cast %24 : vector<1x1x32xf32> to vector<1x32xf32>
    %26 = vector.broadcast %25 : vector<1x32xf32> to vector<8x32xf32>
    %27 = arith.addf %23, %26 : vector<8x32xf32>
    %cst_29 = arith.constant dense<0.000000e+00> : vector<8x8xf32>
    %28 = tpu.matmul %13, %20, %cst_29 {dimension_numbers = #tpu.dot_dimension_numbers<[1], [1], [0], [0], [0, 0, 1, 0], [], []>} : vector<8x32xf32>, vector<8x32xf32>, vector<8x8xf32> -> vector<8x8xf32>
    %cst_30 = arith.constant 0.176776692 : f32
    %29 = vector.broadcast %cst_30 : f32 to vector<8x8xf32>
    %30 = arith.mulf %28, %29 : vector<8x8xf32>
    %31 = arith.addf %30, %5 : vector<8x8xf32>
    %cst_31 = arith.constant dense<0xFF800000> : vector<8xf32>
    %32 = vector.multi_reduction <maximumf>, %31, %cst_31 [1] : vector<8x8xf32> to vector<8xf32>
    %33 = vector.shape_cast %32 : vector<8xf32> to vector<8x1xf32>
    %34 = vector.broadcast %33 : vector<8x1xf32> to vector<8x8xf32>
    %35 = arith.subf %31, %34 : vector<8x8xf32>
    %36 = math.exp %35 : vector<8x8xf32>
    %cst_32 = arith.constant dense<0.000000e+00> : vector<8xf32>
    %37 = vector.multi_reduction <add>, %36, %cst_32 [1] : vector<8x8xf32> to vector<8xf32>
    %38 = vector.shape_cast %37 : vector<8xf32> to vector<8x1xf32>
    %39 = tpu.reciprocal %38 {approx = true} : vector<8x1xf32> -> vector<8x1xf32>
    %40 = vector.broadcast %39 : vector<8x1xf32> to vector<8x8xf32>
    %41 = arith.mulf %36, %40 : vector<8x8xf32>
    %cst_33 = arith.constant dense<0.000000e+00> : vector<8x32xf32>
    %42 = tpu.matmul %41, %27, %cst_33 {dimension_numbers = #tpu.dot_dimension_numbers<[1], [0], [0], [1], [0, 0, 1, 1], [], []>} : vector<8x8xf32>, vector<8x32xf32>, vector<8x32xf32> -> vector<8x32xf32>
    %c0_34 = arith.constant 0 : index
    %c0_35 = arith.constant 0 : index
    %c0_36 = arith.constant 0 : index
    %43 = vector.load %arg6[%c0_34, %c0_35, %c0_36] : memref<4x32x128xf32, #tpu.memory_space<vmem>>, vector<1x32x128xf32>
    %44 = vector.shape_cast %43 : vector<1x32x128xf32> to vector<32x128xf32>
    %cst_37 = arith.constant dense<0.000000e+00> : vector<8x128xf32>
    %45 = tpu.matmul %42, %44, %cst_37 {dimension_numbers = #tpu.dot_dimension_numbers<[1], [0], [0], [1], [0, 0, 1, 1], [], []>} : vector<8x32xf32>, vector<32x128xf32>, vector<8x128xf32> -> vector<8x128xf32>
    %46 = arith.addf %6, %45 : vector<8x128xf32>
    %c1 = arith.constant 1 : index
    %c0_38 = arith.constant 0 : index
    %c0_39 = arith.constant 0 : index
    %47 = vector.load %arg3[%c1, %c0_38, %c0_39] : memref<4x128x32xf32, #tpu.memory_space<vmem>>, vector<1x128x32xf32>
    %48 = vector.shape_cast %47 : vector<1x128x32xf32> to vector<128x32xf32>
    %cst_40 = arith.constant dense<0.000000e+00> : vector<8x32xf32>
    %49 = tpu.matmul %1, %48, %cst_40 {dimension_numbers = #tpu.dot_dimension_numbers<[1], [0], [0], [1], [0, 0, 1, 1], [], []>} : vector<8x128xf32>, vector<128x32xf32>, vector<8x32xf32> -> vector<8x32xf32>
    %c1_41 = arith.constant 1 : index
    %c0_42 = arith.constant 0 : index
    %c0_43 = arith.constant 0 : index
    %50 = vector.load %arg7[%c1_41, %c0_42, %c0_43] : memref<4x1x32xf32, #tpu.memory_space<vmem>>, vector<1x1x32xf32>
    %51 = vector.shape_cast %50 : vector<1x1x32xf32> to vector<1x32xf32>
    %52 = vector.broadcast %51 : vector<1x32xf32> to vector<8x32xf32>
    %53 = arith.addf %49, %52 : vector<8x32xf32>
    %c1_44 = arith.constant 1 : index
    %c0_45 = arith.constant 0 : index
    %c0_46 = arith.constant 0 : index
    %54 = vector.load %arg4[%c1_44, %c0_45, %c0_46] : memref<4x128x32xf32, #tpu.memory_space<vmem>>, vector<1x128x32xf32>
    %55 = vector.shape_cast %54 : vector<1x128x32xf32> to vector<128x32xf32>
    %cst_47 = arith.constant dense<0.000000e+00> : vector<8x32xf32>
    %56 = tpu.matmul %3, %55, %cst_47 {dimension_numbers = #tpu.dot_dimension_numbers<[1], [0], [0], [1], [0, 0, 1, 1], [], []>} : vector<8x128xf32>, vector<128x32xf32>, vector<8x32xf32> -> vector<8x32xf32>
    %c1_48 = arith.constant 1 : index
    %c0_49 = arith.constant 0 : index
    %c0_50 = arith.constant 0 : index
    %57 = vector.load %arg8[%c1_48, %c0_49, %c0_50] : memref<4x1x32xf32, #tpu.memory_space<vmem>>, vector<1x1x32xf32>
    %58 = vector.shape_cast %57 : vector<1x1x32xf32> to vector<1x32xf32>
    %59 = vector.broadcast %58 : vector<1x32xf32> to vector<8x32xf32>
    %60 = arith.addf %56, %59 : vector<8x32xf32>
    %c1_51 = arith.constant 1 : index
    %c0_52 = arith.constant 0 : index
    %c0_53 = arith.constant 0 : index
    %61 = vector.load %arg5[%c1_51, %c0_52, %c0_53] : memref<4x128x32xf32, #tpu.memory_space<vmem>>, vector<1x128x32xf32>
    %62 = vector.shape_cast %61 : vector<1x128x32xf32> to vector<128x32xf32>
    %cst_54 = arith.constant dense<0.000000e+00> : vector<8x32xf32>
    %63 = tpu.matmul %3, %62, %cst_54 {dimension_numbers = #tpu.dot_dimension_numbers<[1], [0], [0], [1], [0, 0, 1, 1], [], []>} : vector<8x128xf32>, vector<128x32xf32>, vector<8x32xf32> -> vector<8x32xf32>
    %c1_55 = arith.constant 1 : index
    %c0_56 = arith.constant 0 : index
    %c0_57 = arith.constant 0 : index
    %64 = vector.load %arg9[%c1_55, %c0_56, %c0_57] : memref<4x1x32xf32, #tpu.memory_space<vmem>>, vector<1x1x32xf32>
    %65 = vector.shape_cast %64 : vector<1x1x32xf32> to vector<1x32xf32>
    %66 = vector.broadcast %65 : vector<1x32xf32> to vector<8x32xf32>
    %67 = arith.addf %63, %66 : vector<8x32xf32>
    %cst_58 = arith.constant dense<0.000000e+00> : vector<8x8xf32>
    %68 = tpu.matmul %53, %60, %cst_58 {dimension_numbers = #tpu.dot_dimension_numbers<[1], [1], [0], [0], [0, 0, 1, 0], [], []>} : vector<8x32xf32>, vector<8x32xf32>, vector<8x8xf32> -> vector<8x8xf32>
    %cst_59 = arith.constant 0.176776692 : f32
    %69 = vector.broadcast %cst_59 : f32 to vector<8x8xf32>
    %70 = arith.mulf %68, %69 : vector<8x8xf32>
    %71 = arith.addf %70, %5 : vector<8x8xf32>
    %cst_60 = arith.constant dense<0xFF800000> : vector<8xf32>
    %72 = vector.multi_reduction <maximumf>, %71, %cst_60 [1] : vector<8x8xf32> to vector<8xf32>
    %73 = vector.shape_cast %72 : vector<8xf32> to vector<8x1xf32>
    %74 = vector.broadcast %73 : vector<8x1xf32> to vector<8x8xf32>
    %75 = arith.subf %71, %74 : vector<8x8xf32>
    %76 = math.exp %75 : vector<8x8xf32>
    %cst_61 = arith.constant dense<0.000000e+00> : vector<8xf32>
    %77 = vector.multi_reduction <add>, %76, %cst_61 [1] : vector<8x8xf32> to vector<8xf32>
    %78 = vector.shape_cast %77 : vector<8xf32> to vector<8x1xf32>
    %79 = tpu.reciprocal %78 {approx = true} : vector<8x1xf32> -> vector<8x1xf32>
    %80 = vector.broadcast %79 : vector<8x1xf32> to vector<8x8xf32>
    %81 = arith.mulf %76, %80 : vector<8x8xf32>
    %cst_62 = arith.constant dense<0.000000e+00> : vector<8x32xf32>
    %82 = tpu.matmul %81, %67, %cst_62 {dimension_numbers = #tpu.dot_dimension_numbers<[1], [0], [0], [1], [0, 0, 1, 1], [], []>} : vector<8x8xf32>, vector<8x32xf32>, vector<8x32xf32> -> vector<8x32xf32>
    %c1_63 = arith.constant 1 : index
    %c0_64 = arith.constant 0 : index
    %c0_65 = arith.constant 0 : index
    %83 = vector.load %arg6[%c1_63, %c0_64, %c0_65] : memref<4x32x128xf32, #tpu.memory_space<vmem>>, vector<1x32x128xf32>
    %84 = vector.shape_cast %83 : vector<1x32x128xf32> to vector<32x128xf32>
    %cst_66 = arith.constant dense<0.000000e+00> : vector<8x128xf32>
    %85 = tpu.matmul %82, %84, %cst_66 {dimension_numbers = #tpu.dot_dimension_numbers<[1], [0], [0], [1], [0, 0, 1, 1], [], []>} : vector<8x32xf32>, vector<32x128xf32>, vector<8x128xf32> -> vector<8x128xf32>
    %86 = arith.addf %46, %85 : vector<8x128xf32>
    %c2 = arith.constant 2 : index
    %c0_67 = arith.constant 0 : index
    %c0_68 = arith.constant 0 : index
    %87 = vector.load %arg3[%c2, %c0_67, %c0_68] : memref<4x128x32xf32, #tpu.memory_space<vmem>>, vector<1x128x32xf32>
    %88 = vector.shape_cast %87 : vector<1x128x32xf32> to vector<128x32xf32>
    %cst_69 = arith.constant dense<0.000000e+00> : vector<8x32xf32>
    %89 = tpu.matmul %1, %88, %cst_69 {dimension_numbers = #tpu.dot_dimension_numbers<[1], [0], [0], [1], [0, 0, 1, 1], [], []>} : vector<8x128xf32>, vector<128x32xf32>, vector<8x32xf32> -> vector<8x32xf32>
    %c2_70 = arith.constant 2 : index
    %c0_71 = arith.constant 0 : index
    %c0_72 = arith.constant 0 : index
    %90 = vector.load %arg7[%c2_70, %c0_71, %c0_72] : memref<4x1x32xf32, #tpu.memory_space<vmem>>, vector<1x1x32xf32>
    %91 = vector.shape_cast %90 : vector<1x1x32xf32> to vector<1x32xf32>
    %92 = vector.broadcast %91 : vector<1x32xf32> to vector<8x32xf32>
    %93 = arith.addf %89, %92 : vector<8x32xf32>
    %c2_73 = arith.constant 2 : index
    %c0_74 = arith.constant 0 : index
    %c0_75 = arith.constant 0 : index
    %94 = vector.load %arg4[%c2_73, %c0_74, %c0_75] : memref<4x128x32xf32, #tpu.memory_space<vmem>>, vector<1x128x32xf32>
    %95 = vector.shape_cast %94 : vector<1x128x32xf32> to vector<128x32xf32>
    %cst_76 = arith.constant dense<0.000000e+00> : vector<8x32xf32>
    %96 = tpu.matmul %3, %95, %cst_76 {dimension_numbers = #tpu.dot_dimension_numbers<[1], [0], [0], [1], [0, 0, 1, 1], [], []>} : vector<8x128xf32>, vector<128x32xf32>, vector<8x32xf32> -> vector<8x32xf32>
    %c2_77 = arith.constant 2 : index
    %c0_78 = arith.constant 0 : index
    %c0_79 = arith.constant 0 : index
    %97 = vector.load %arg8[%c2_77, %c0_78, %c0_79] : memref<4x1x32xf32, #tpu.memory_space<vmem>>, vector<1x1x32xf32>
    %98 = vector.shape_cast %97 : vector<1x1x32xf32> to vector<1x32xf32>
    %99 = vector.broadcast %98 : vector<1x32xf32> to vector<8x32xf32>
    %100 = arith.addf %96, %99 : vector<8x32xf32>
    %c2_80 = arith.constant 2 : index
    %c0_81 = arith.constant 0 : index
    %c0_82 = arith.constant 0 : index
    %101 = vector.load %arg5[%c2_80, %c0_81, %c0_82] : memref<4x128x32xf32, #tpu.memory_space<vmem>>, vector<1x128x32xf32>
    %102 = vector.shape_cast %101 : vector<1x128x32xf32> to vector<128x32xf32>
    %cst_83 = arith.constant dense<0.000000e+00> : vector<8x32xf32>
    %103 = tpu.matmul %3, %102, %cst_83 {dimension_numbers = #tpu.dot_dimension_numbers<[1], [0], [0], [1], [0, 0, 1, 1], [], []>} : vector<8x128xf32>, vector<128x32xf32>, vector<8x32xf32> -> vector<8x32xf32>
    %c2_84 = arith.constant 2 : index
    %c0_85 = arith.constant 0 : index
    %c0_86 = arith.constant 0 : index
    %104 = vector.load %arg9[%c2_84, %c0_85, %c0_86] : memref<4x1x32xf32, #tpu.memory_space<vmem>>, vector<1x1x32xf32>
    %105 = vector.shape_cast %104 : vector<1x1x32xf32> to vector<1x32xf32>
    %106 = vector.broadcast %105 : vector<1x32xf32> to vector<8x32xf32>
    %107 = arith.addf %103, %106 : vector<8x32xf32>
    %cst_87 = arith.constant dense<0.000000e+00> : vector<8x8xf32>
    %108 = tpu.matmul %93, %100, %cst_87 {dimension_numbers = #tpu.dot_dimension_numbers<[1], [1], [0], [0], [0, 0, 1, 0], [], []>} : vector<8x32xf32>, vector<8x32xf32>, vector<8x8xf32> -> vector<8x8xf32>
    %cst_88 = arith.constant 0.176776692 : f32
    %109 = vector.broadcast %cst_88 : f32 to vector<8x8xf32>
    %110 = arith.mulf %108, %109 : vector<8x8xf32>
    %111 = arith.addf %110, %5 : vector<8x8xf32>
    %cst_89 = arith.constant dense<0xFF800000> : vector<8xf32>
    %112 = vector.multi_reduction <maximumf>, %111, %cst_89 [1] : vector<8x8xf32> to vector<8xf32>
    %113 = vector.shape_cast %112 : vector<8xf32> to vector<8x1xf32>
    %114 = vector.broadcast %113 : vector<8x1xf32> to vector<8x8xf32>
    %115 = arith.subf %111, %114 : vector<8x8xf32>
    %116 = math.exp %115 : vector<8x8xf32>
    %cst_90 = arith.constant dense<0.000000e+00> : vector<8xf32>
    %117 = vector.multi_reduction <add>, %116, %cst_90 [1] : vector<8x8xf32> to vector<8xf32>
    %118 = vector.shape_cast %117 : vector<8xf32> to vector<8x1xf32>
    %119 = tpu.reciprocal %118 {approx = true} : vector<8x1xf32> -> vector<8x1xf32>
    %120 = vector.broadcast %119 : vector<8x1xf32> to vector<8x8xf32>
    %121 = arith.mulf %116, %120 : vector<8x8xf32>
    %cst_91 = arith.constant dense<0.000000e+00> : vector<8x32xf32>
    %122 = tpu.matmul %121, %107, %cst_91 {dimension_numbers = #tpu.dot_dimension_numbers<[1], [0], [0], [1], [0, 0, 1, 1], [], []>} : vector<8x8xf32>, vector<8x32xf32>, vector<8x32xf32> -> vector<8x32xf32>
    %c2_92 = arith.constant 2 : index
    %c0_93 = arith.constant 0 : index
    %c0_94 = arith.constant 0 : index
    %123 = vector.load %arg6[%c2_92, %c0_93, %c0_94] : memref<4x32x128xf32, #tpu.memory_space<vmem>>, vector<1x32x128xf32>
    %124 = vector.shape_cast %123 : vector<1x32x128xf32> to vector<32x128xf32>
    %cst_95 = arith.constant dense<0.000000e+00> : vector<8x128xf32>
    %125 = tpu.matmul %122, %124, %cst_95 {dimension_numbers = #tpu.dot_dimension_numbers<[1], [0], [0], [1], [0, 0, 1, 1], [], []>} : vector<8x32xf32>, vector<32x128xf32>, vector<8x128xf32> -> vector<8x128xf32>
    %126 = arith.addf %86, %125 : vector<8x128xf32>
    %c3 = arith.constant 3 : index
    %c0_96 = arith.constant 0 : index
    %c0_97 = arith.constant 0 : index
    %127 = vector.load %arg3[%c3, %c0_96, %c0_97] : memref<4x128x32xf32, #tpu.memory_space<vmem>>, vector<1x128x32xf32>
    %128 = vector.shape_cast %127 : vector<1x128x32xf32> to vector<128x32xf32>
    %cst_98 = arith.constant dense<0.000000e+00> : vector<8x32xf32>
    %129 = tpu.matmul %1, %128, %cst_98 {dimension_numbers = #tpu.dot_dimension_numbers<[1], [0], [0], [1], [0, 0, 1, 1], [], []>} : vector<8x128xf32>, vector<128x32xf32>, vector<8x32xf32> -> vector<8x32xf32>
    %c3_99 = arith.constant 3 : index
    %c0_100 = arith.constant 0 : index
    %c0_101 = arith.constant 0 : index
    %130 = vector.load %arg7[%c3_99, %c0_100, %c0_101] : memref<4x1x32xf32, #tpu.memory_space<vmem>>, vector<1x1x32xf32>
    %131 = vector.shape_cast %130 : vector<1x1x32xf32> to vector<1x32xf32>
    %132 = vector.broadcast %131 : vector<1x32xf32> to vector<8x32xf32>
    %133 = arith.addf %129, %132 : vector<8x32xf32>
    %c3_102 = arith.constant 3 : index
    %c0_103 = arith.constant 0 : index
    %c0_104 = arith.constant 0 : index
    %134 = vector.load %arg4[%c3_102, %c0_103, %c0_104] : memref<4x128x32xf32, #tpu.memory_space<vmem>>, vector<1x128x32xf32>
    %135 = vector.shape_cast %134 : vector<1x128x32xf32> to vector<128x32xf32>
    %cst_105 = arith.constant dense<0.000000e+00> : vector<8x32xf32>
    %136 = tpu.matmul %3, %135, %cst_105 {dimension_numbers = #tpu.dot_dimension_numbers<[1], [0], [0], [1], [0, 0, 1, 1], [], []>} : vector<8x128xf32>, vector<128x32xf32>, vector<8x32xf32> -> vector<8x32xf32>
    %c3_106 = arith.constant 3 : index
    %c0_107 = arith.constant 0 : index
    %c0_108 = arith.constant 0 : index
    %137 = vector.load %arg8[%c3_106, %c0_107, %c0_108] : memref<4x1x32xf32, #tpu.memory_space<vmem>>, vector<1x1x32xf32>
    %138 = vector.shape_cast %137 : vector<1x1x32xf32> to vector<1x32xf32>
    %139 = vector.broadcast %138 : vector<1x32xf32> to vector<8x32xf32>
    %140 = arith.addf %136, %139 : vector<8x32xf32>
    %c3_109 = arith.constant 3 : index
    %c0_110 = arith.constant 0 : index
    %c0_111 = arith.constant 0 : index
    %141 = vector.load %arg5[%c3_109, %c0_110, %c0_111] : memref<4x128x32xf32, #tpu.memory_space<vmem>>, vector<1x128x32xf32>
    %142 = vector.shape_cast %141 : vector<1x128x32xf32> to vector<128x32xf32>
    %cst_112 = arith.constant dense<0.000000e+00> : vector<8x32xf32>
    %143 = tpu.matmul %3, %142, %cst_112 {dimension_numbers = #tpu.dot_dimension_numbers<[1], [0], [0], [1], [0, 0, 1, 1], [], []>} : vector<8x128xf32>, vector<128x32xf32>, vector<8x32xf32> -> vector<8x32xf32>
    %c3_113 = arith.constant 3 : index
    %c0_114 = arith.constant 0 : index
    %c0_115 = arith.constant 0 : index
    %144 = vector.load %arg9[%c3_113, %c0_114, %c0_115] : memref<4x1x32xf32, #tpu.memory_space<vmem>>, vector<1x1x32xf32>
    %145 = vector.shape_cast %144 : vector<1x1x32xf32> to vector<1x32xf32>
    %146 = vector.broadcast %145 : vector<1x32xf32> to vector<8x32xf32>
    %147 = arith.addf %143, %146 : vector<8x32xf32>
    %cst_116 = arith.constant dense<0.000000e+00> : vector<8x8xf32>
    %148 = tpu.matmul %133, %140, %cst_116 {dimension_numbers = #tpu.dot_dimension_numbers<[1], [1], [0], [0], [0, 0, 1, 0], [], []>} : vector<8x32xf32>, vector<8x32xf32>, vector<8x8xf32> -> vector<8x8xf32>
    %cst_117 = arith.constant 0.176776692 : f32
    %149 = vector.broadcast %cst_117 : f32 to vector<8x8xf32>
    %150 = arith.mulf %148, %149 : vector<8x8xf32>
    %151 = arith.addf %150, %5 : vector<8x8xf32>
    %cst_118 = arith.constant dense<0xFF800000> : vector<8xf32>
    %152 = vector.multi_reduction <maximumf>, %151, %cst_118 [1] : vector<8x8xf32> to vector<8xf32>
    %153 = vector.shape_cast %152 : vector<8xf32> to vector<8x1xf32>
    %154 = vector.broadcast %153 : vector<8x1xf32> to vector<8x8xf32>
    %155 = arith.subf %151, %154 : vector<8x8xf32>
    %156 = math.exp %155 : vector<8x8xf32>
    %cst_119 = arith.constant dense<0.000000e+00> : vector<8xf32>
    %157 = vector.multi_reduction <add>, %156, %cst_119 [1] : vector<8x8xf32> to vector<8xf32>
    %158 = vector.shape_cast %157 : vector<8xf32> to vector<8x1xf32>
    %159 = tpu.reciprocal %158 {approx = true} : vector<8x1xf32> -> vector<8x1xf32>
    %160 = vector.broadcast %159 : vector<8x1xf32> to vector<8x8xf32>
    %161 = arith.mulf %156, %160 : vector<8x8xf32>
    %cst_120 = arith.constant dense<0.000000e+00> : vector<8x32xf32>
    %162 = tpu.matmul %161, %147, %cst_120 {dimension_numbers = #tpu.dot_dimension_numbers<[1], [0], [0], [1], [0, 0, 1, 1], [], []>} : vector<8x8xf32>, vector<8x32xf32>, vector<8x32xf32> -> vector<8x32xf32>
    %c3_121 = arith.constant 3 : index
    %c0_122 = arith.constant 0 : index
    %c0_123 = arith.constant 0 : index
    %163 = vector.load %arg6[%c3_121, %c0_122, %c0_123] : memref<4x32x128xf32, #tpu.memory_space<vmem>>, vector<1x32x128xf32>
    %164 = vector.shape_cast %163 : vector<1x32x128xf32> to vector<32x128xf32>
    %cst_124 = arith.constant dense<0.000000e+00> : vector<8x128xf32>
    %165 = tpu.matmul %162, %164, %cst_124 {dimension_numbers = #tpu.dot_dimension_numbers<[1], [0], [0], [1], [0, 0, 1, 1], [], []>} : vector<8x32xf32>, vector<32x128xf32>, vector<8x128xf32> -> vector<8x128xf32>
    %166 = arith.addf %126, %165 : vector<8x128xf32>
    %167 = arith.addf %1, %166 : vector<8x128xf32>
    %c0_125 = arith.constant 0 : index
    %c0_126 = arith.constant 0 : index
    %168 = vector.load %arg10[%c0_125, %c0_126] : memref<1x128xf32, #tpu.memory_space<vmem>>, vector<1x128xf32>
    %169 = vector.broadcast %168 : vector<1x128xf32> to vector<8x128xf32>
    %170 = arith.addf %167, %169 : vector<8x128xf32>
    %cst_127 = arith.constant dense<0.000000e+00> : vector<8xf32>
    %171 = vector.multi_reduction <add>, %170, %cst_127 [1] : vector<8x128xf32> to vector<8xf32>
    %172 = vector.shape_cast %171 : vector<8xf32> to vector<8x1xf32>
    %cst_128 = arith.constant 1.280000e+02 : f32
    %173 = vector.broadcast %cst_128 : f32 to vector<8x1xf32>
    %174 = arith.divf %172, %173 : vector<8x1xf32>
    %175 = vector.broadcast %174 : vector<8x1xf32> to vector<8x128xf32>
    %176 = arith.subf %170, %175 : vector<8x128xf32>
    %177 = arith.mulf %176, %176 : vector<8x128xf32>
    %cst_129 = arith.constant dense<0.000000e+00> : vector<8xf32>
    %178 = vector.multi_reduction <add>, %177, %cst_129 [1] : vector<8x128xf32> to vector<8xf32>
    %179 = vector.shape_cast %178 : vector<8xf32> to vector<8x1xf32>
    %cst_130 = arith.constant 1.280000e+02 : f32
    %180 = vector.broadcast %cst_130 : f32 to vector<8x1xf32>
    %181 = arith.divf %179, %180 : vector<8x1xf32>
    %182 = vector.broadcast %174 : vector<8x1xf32> to vector<8x128xf32>
    %183 = arith.subf %170, %182 : vector<8x128xf32>
    %cst_131 = arith.constant 9.99999974E-6 : f32
    %184 = vector.broadcast %cst_131 : f32 to vector<8x1xf32>
    %185 = arith.addf %181, %184 : vector<8x1xf32>
    %186 = math.rsqrt %185 : vector<8x1xf32>
    %187 = vector.broadcast %186 : vector<8x1xf32> to vector<8x128xf32>
    %188 = arith.mulf %183, %187 : vector<8x128xf32>
    %c0_132 = arith.constant 0 : index
    %c0_133 = arith.constant 0 : index
    %189 = vector.load %arg12[%c0_132, %c0_133] : memref<1x128xf32, #tpu.memory_space<vmem>>, vector<1x128xf32>
    %190 = vector.broadcast %189 : vector<1x128xf32> to vector<8x128xf32>
    %191 = arith.mulf %188, %190 : vector<8x128xf32>
    %c0_134 = arith.constant 0 : index
    %c0_135 = arith.constant 0 : index
    %192 = vector.load %arg13[%c0_134, %c0_135] : memref<1x128xf32, #tpu.memory_space<vmem>>, vector<1x128xf32>
    %193 = vector.broadcast %192 : vector<1x128xf32> to vector<8x128xf32>
    %194 = arith.addf %191, %193 : vector<8x128xf32>
    %c0_136 = arith.constant 0 : index
    %c0_137 = arith.constant 0 : index
    %c0_138 = arith.constant 0 : index
    %195 = vector.load %arg14[%c0_136, %c0_137, %c0_138] : memref<1x8x128xf32, #tpu.memory_space<vmem>>, vector<1x8x128xf32>
    %196 = vector.shape_cast %195 : vector<1x8x128xf32> to vector<8x128xf32>
    %197 = vector.shape_cast %194 : vector<8x128xf32> to vector<1x8x128xf32>
    tpu.vector_store %arg14[%c0_136, %c0_137, %c0_138], %197 {strides = array<i32>} : memref<1x8x128xf32, #tpu.memory_space<vmem>>, vector<1x8x128xf32>,
    return
  }
  func.func @transform_0(%arg0: i32) -> (i32, i32, i32) {
    %c0_i32 = arith.constant 0 : i32
    %c0_i32_0 = arith.constant 0 : i32
    %c0_i32_1 = arith.constant 0 : i32
    return %arg0, %c0_i32, %c0_i32_0 : i32, i32, i32
  }
  func.func @transform_1(%arg0: i32) -> (i32, i32, i32) {
    %c0_i32 = arith.constant 0 : i32
    %c0_i32_0 = arith.constant 0 : i32
    %c0_i32_1 = arith.constant 0 : i32
    return %arg0, %c0_i32, %c0_i32_0 : i32, i32, i32
  }
  func.func @transform_2(%arg0: i32) -> (i32, i32, i32) {
    %c0_i32 = arith.constant 0 : i32
    %c0_i32_0 = arith.constant 0 : i32
    %c0_i32_1 = arith.constant 0 : i32
    %c0_i32_2 = arith.constant 0 : i32
    return %c0_i32, %c0_i32_0, %c0_i32_1 : i32, i32, i32
  }
  func.func @transform_3(%arg0: i32) -> (i32, i32, i32) {
    %c0_i32 = arith.constant 0 : i32
    %c0_i32_0 = arith.constant 0 : i32
    %c0_i32_1 = arith.constant 0 : i32
    %c0_i32_2 = arith.constant 0 : i32
    return %c0_i32, %c0_i32_0, %c0_i32_1 : i32, i32, i32
  }
  func.func @transform_4(%arg0: i32) -> (i32, i32, i32) {
    %c0_i32 = arith.constant 0 : i32
    %c0_i32_0 = arith.constant 0 : i32
    %c0_i32_1 = arith.constant 0 : i32
    %c0_i32_2 = arith.constant 0 : i32
    return %c0_i32, %c0_i32_0, %c0_i32_1 : i32, i32, i32
  }
  func.func @transform_5(%arg0: i32) -> (i32, i32, i32) {
    %c0_i32 = arith.constant 0 : i32
    %c0_i32_0 = arith.constant 0 : i32
    %c0_i32_1 = arith.constant 0 : i32
    %c0_i32_2 = arith.constant 0 : i32
    return %c0_i32, %c0_i32_0, %c0_i32_1 : i32, i32, i32
  }
  func.func @transform_6(%arg0: i32) -> (i32, i32, i32) {
    %c0_i32 = arith.constant 0 : i32
    %c0_i32_0 = arith.constant 0 : i32
    %c0_i32_1 = arith.constant 0 : i32
    %c0_i32_2 = arith.constant 0 : i32
    return %c0_i32, %c0_i32_0, %c0_i32_1 : i32, i32, i32
  }
  func.func @transform_7(%arg0: i32) -> (i32, i32, i32) {
    %c0_i32 = arith.constant 0 : i32
    %c0_i32_0 = arith.constant 0 : i32
    %c0_i32_1 = arith.constant 0 : i32
    %c0_i32_2 = arith.constant 0 : i32
    return %c0_i32, %c0_i32_0, %c0_i32_1 : i32, i32, i32
  }
  func.func @transform_8(%arg0: i32) -> (i32, i32, i32) {
    %c0_i32 = arith.constant 0 : i32
    %c0_i32_0 = arith.constant 0 : i32
    %c0_i32_1 = arith.constant 0 : i32
    %c0_i32_2 = arith.constant 0 : i32
    return %c0_i32, %c0_i32_0, %c0_i32_1 : i32, i32, i32
  }
  func.func @transform_9(%arg0: i32) -> (i32, i32) {
    %c0_i32 = arith.constant 0 : i32
    %c0_i32_0 = arith.constant 0 : i32
    %c0_i32_1 = arith.constant 0 : i32
    return %c0_i32, %c0_i32_0 : i32, i32
  }
  func.func @transform_10(%arg0: i32) -> (i32, i32, i32) {
    %c0_i32 = arith.constant 0 : i32
    %c0_i32_0 = arith.constant 0 : i32
    %c0_i32_1 = arith.constant 0 : i32
    return %arg0, %c0_i32, %c0_i32_0 : i32, i32, i32
  }
  func.func @transform_11(%arg0: i32) -> (i32, i32) {
    %c0_i32 = arith.constant 0 : i32
    %c0_i32_0 = arith.constant 0 : i32
    %c0_i32_1 = arith.constant 0 : i32
    return %c0_i32, %c0_i32_0 : i32, i32
  }
  func.func @transform_12(%arg0: i32) -> (i32, i32) {
    %c0_i32 = arith.constant 0 : i32
    %c0_i32_0 = arith.constant 0 : i32
    %c0_i32_1 = arith.constant 0 : i32
    return %c0_i32, %c0_i32_0 : i32, i32
  }
  func.func @transform_13(%arg0: i32) -> (i32, i32, i32) {
    %c0_i32 = arith.constant 0 : i32
    %c0_i32_0 = arith.constant 0 : i32
    %c0_i32_1 = arith.constant 0 : i32
    return %arg0, %c0_i32, %c0_i32_0 : i32, i32, i32
  }
}

module attributes {stable_mosaic.version = 11 : i64} {
  func.func @_linear_kernel(%arg0: i32, %arg1: i32, %arg2: memref<16x128xf32, #tpu.memory_space<vmem>>, %arg3: memref<128x128xf32, #tpu.memory_space<vmem>>, %arg4: memref<1x128xf32, #tpu.memory_space<vmem>>, %arg5: memref<16x128xf32, #tpu.memory_space<vmem>>) attributes {dimension_semantics = [#tpu.dimension_semantics<parallel>, #tpu.dimension_semantics<parallel>], iteration_bounds = array<i64: 1, 1>, scalar_prefetch = 0 : i64, scratch_operands = 0 : i64, tpu.core_type = #tpu.core_type<tc>, window_params = [{transform_indices = @transform_0, window_bounds = array<i64: 16, 128>}, {transform_indices = @transform_1, window_bounds = array<i64: 128, 128>}, {transform_indices = @transform_2, window_bounds = array<i64: 1, 128>}, {transform_indices = @transform_3, window_bounds = array<i64: 16, 128>}]} {
    %c0 = arith.constant 0 : index
    %c0_0 = arith.constant 0 : index
    %0 = vector.load %arg2[%c0, %c0_0] : memref<16x128xf32, #tpu.memory_space<vmem>>, vector<16x128xf32>
    %c0_1 = arith.constant 0 : index
    %c0_2 = arith.constant 0 : index
    %1 = vector.load %arg3[%c0_1, %c0_2] : memref<128x128xf32, #tpu.memory_space<vmem>>, vector<128x128xf32>
    %cst = arith.constant dense<0.000000e+00> : vector<16x128xf32>
    %2 = tpu.matmul %0, %1, %cst {dimension_numbers = #tpu.dot_dimension_numbers<[1], [0], [0], [1], [0, 0, 1, 1], [], []>} : vector<16x128xf32>, vector<128x128xf32>, vector<16x128xf32> -> vector<16x128xf32>
    %c0_3 = arith.constant 0 : index
    %c0_4 = arith.constant 0 : index
    %3 = vector.load %arg4[%c0_3, %c0_4] : memref<1x128xf32, #tpu.memory_space<vmem>>, vector<1x128xf32>
    %4 = vector.broadcast %3 : vector<1x128xf32> to vector<16x128xf32>
    %5 = arith.addf %2, %4 : vector<16x128xf32>
    %c0_5 = arith.constant 0 : index
    %c0_6 = arith.constant 0 : index
    %6 = vector.load %arg5[%c0_5, %c0_6] : memref<16x128xf32, #tpu.memory_space<vmem>>, vector<16x128xf32>
    tpu.vector_store %arg5[%c0_5, %c0_6], %5 {strides = array<i32>} : memref<16x128xf32, #tpu.memory_space<vmem>>, vector<16x128xf32>,
    return
  }
  func.func @transform_0(%arg0: i32, %arg1: i32) -> (i32, i32) {
    %c0_i32 = arith.constant 0 : i32
    %c0_i32_0 = arith.constant 0 : i32
    return %arg0, %c0_i32 : i32, i32
  }
  func.func @transform_1(%arg0: i32, %arg1: i32) -> (i32, i32) {
    %c0_i32 = arith.constant 0 : i32
    %c0_i32_0 = arith.constant 0 : i32
    return %c0_i32, %arg1 : i32, i32
  }
  func.func @transform_2(%arg0: i32, %arg1: i32) -> (i32, i32) {
    %c0_i32 = arith.constant 0 : i32
    %c0_i32_0 = arith.constant 0 : i32
    return %c0_i32, %arg1 : i32, i32
  }
  func.func @transform_3(%arg0: i32, %arg1: i32) -> (i32, i32) {
    %c0_i32 = arith.constant 0 : i32
    return %arg0, %arg1 : i32, i32
  }
}

</mosaic_0001>

<bundles_post_ra>
// kernel: tile.19
= control target key start
LH: loop header
LB: loop body
LE: loop exit
PB: predicated region body
PF: predicated region fallthrough
CT: control target
= control target key end

     0   :  { %vm8_vm0 = vcmask 64512   ;;  %vm14_vm1 = vcmask 130112   ;;  %s42_s0 = inlined_call_operand.vmem [shape: s32[2,8], index: 0, kind: input, shape index: {}]   ;;  %s43_s1 = inlined_call_operand.vmem [shape: s32[16], index: 1, kind: output, shape index: {}]  }
   0x1   :  { %v5_v0 = vld [vmem:[%s42_s0] sm:$0x3]  ;;  %s25_s0 = smov 8  }
   0x2   :  { %6 = vst [vmem:[#allocation1] sm:$0x3] %v5_v0 }
   0x9   :  { %v11_v1 = vld [vmem:[#allocation1 + $0x1] sm:$0x1]   ;;  %v7_v2 = vld [vmem:[#allocation1] sm:$0x1]  }
   0xa   :  { %12 = vrot.lane.b32.xlu0 %v11_v1, %s25_s0  ;;  %9 = vst.msk [vmem:[#allocation0] sm:$0x1] %vm8_vm0, %v7_v2  }
  0x7c   :  { %v13_v3 = vpop.permute.xlu0 %12  }
  0x7d   :  { %15 = vst.msk [vmem:[#allocation0] sm:$0x1] %vm14_vm1, %v13_v3  }
  0x84   :  { %v20_v4 = vld [vmem:[#allocation0] sm:$0x1] }
  0x85   :  { %23 = vst [vmem:[%s43_s1] sm:$0x1] %v20_v4 }

// kernel: seq2seq_transformer_forward.13
= control target key start
LH: loop header
LB: loop body
LE: loop exit
PB: predicated region body
PF: predicated region fallthrough
CT: control target
= control target key end

     0   :  { %s324_s0 = inlined_call_operand.vmem [shape: s32[16], index: 0, kind: input, shape index: {}]   ;;  %s325_s2 = inlined_call_operand.vmem [shape: f32[128,1,128], index: 2, kind: input, shape index: {}]   ;;  %s326_s3 = inlined_call_operand.vmem [shape: f32[64,1,128], index: 3, kind: input, shape index: {}]   ;;  %s327_s4 = inlined_call_operand.vmem [shape: f32[16,1,128], index: 4, kind: output, shape index: {}]   ;;  %s328_s1 = inlined_call_operand.vmem [shape: s32[16], index: 1, kind: input, shape index: {}]  }
   0x1   :  { %s9_s17 = sshll.u32 %s324_s0, 4  ;;  %s13_s20 = sshll.u32 %s328_s1, 4  ;;  %s10_s17 = int_to_ptr.vmem [resolvable:$true] %s9_s17  ;;  %s14_s20 = int_to_ptr.vmem [resolvable:$true] %s13_s20 }
   0x2   :  { %s248_s21 = scalar_lea.vmem %s10_s17, 16  ;;  %p253_p1 = scmp.lt.s32.totalorder %s10_s17, %s10_s17 }
   0x3   :  { %p249_p0 = scmp.ne.s32.totalorder %s10_s17, %s248_s21  ;;  %p254_p2 = scmp.lt.s32.totalorder %s248_s21, %s248_s21 }
   0x5   :  { %p255_p3 = por %p254_p2, %p253_p1 }
   0x7   :  { %p256_p4 = pnand %p255_p3, %p249_p0 }
   0x9   :  { %259 = shalt.err (!%p256_p4)  }
   0xa   :  { %s282_s22 = smov [#allocation3]   ;;  %s260_s23 = scalar_lea.vmem %s14_s20, 16 }
   0xb   :  { %12 = dma.vmem_to_smem %s10_s17, 16, %s282_s22, [#allocation2] }
   0xc   :  { %p261_p5 = scmp.ne.s32.totalorder %s14_s20, %s260_s23  ;;  %p265_p6 = scmp.lt.s32.totalorder %s14_s20, %s14_s20 }
   0xd   :  { %p266_p7 = scmp.lt.s32.totalorder %s260_s23, %s260_s23 }
   0xf   :  { %p267_p8 = por %p266_p7, %p265_p6 }
  0x11   :  { %p268_p9 = pnand %p267_p8, %p261_p5 }
  0x13   :  { %271 = shalt.err (!%p268_p9)  }
  0x14   :  { %s283_s0 = smov [#allocation4]  }
  0x15   :  { %16 = dma.vmem_to_smem %s14_s20, 16, %s283_s0, [#allocation2] }
  0x16   :  { %276 = dma.done.wait [#allocation2], 32 }
  0x17   :  { %277 = vsyncadd [#allocation2], 4294967264 }
  0x18   :  { %18 = sfence }
  0x19   :  { %s278_s1 = smov 0  }
  0x1a LB: > { %s231_s24 = sadd.s32 4294967295, %s280_s1   ;;  %p235_p10 = scmp.ge.s32.totalorder %s280_s1, 1  ;;  %s280_s1 = sphi %s278_s1, %s24_s1  }
  0x1b   : > { %p138_p11 = scmp.lt.s32.totalorder %s280_s1, 17 }
  0x1d   : > { %p139_p12 = pnand %p235_p10, %p138_p11 }
  0x1e   : > { %s161_s25 = sld [smem:[#allocation3 + %s231_s24]] (!%p139_p12)  ;;  %p171_p13 = scmp.lt.s32.totalorder (!%p139_p12), %s231_s24, 15 }
  0x1f   : > { %142 = sbr.rel (%p139_p12) target bundleno = 45 (0x2d), region = 28  ;;  %s166_s26 = sld [smem:[#allocation4 + %s231_s24]] (!%p139_p12) }
  0x24   : > { %s330_s24 = smov (!%p171_p13, %s231_s24), 15  ;;  %p162_p0 = scmp.lt.s32.totalorder %s161_s25, 127 }
  0x25   : > { %p167_p1 = scmp.lt.s32.totalorder %s166_s26, 63  ;;  %s173_s9 = scalar_lea.vmem %s327_s4, %s330_s24 }
  0x26   : > { %s332_s25 = smov (!%p162_p0, %s161_s25), 127 }
  0x27   : > { %s334_s26 = smov (!%p167_p1, %s166_s26), 63  ;;  %s164_s29 = scalar_lea.vmem %s325_s2, %s332_s25 }
  0x28   : > { %s169_s6 = scalar_lea.vmem %s326_s3, %s334_s26  ;;  %v174_v0 = vld [vmem:[%s164_s29] sm:$0x1] }
  0x29   : > { %v175_v1 = vld [vmem:[%s169_s6] sm:$0x1] }
  0x2a   : > { %v176_v2 = vadd.f32 %v175_v1, %v174_v0 }
  0x2c   : > { %177 = vst [vmem:[%s173_s9] sm:$0x1] %v176_v2 }
  0x2d PF: > { %s24_s1 = sadd.s32 1, %s280_s1  }
  0x2e   : > { %p21_p2 = scmp.ge.s32.totalorder %s24_s1, 18  }
  0x30   :  { %23 = sbr.rel (!%p21_p2) target bundleno = 26 (0x1a), region = 61 }

// kernel: seq2seq_transformer_forward.16
= control target key start
LH: loop header
LB: loop body
LE: loop exit
PB: predicated region body
PF: predicated region fallthrough
CT: control target
= control target key end

     0   :  { %v362_v3 = vmov 0.0   ;;  %s625_s1 = inlined_call_operand.vmem [shape: f32[128,256], index: 1, kind: input, shape index: {}]   ;;  %s626_s3 = inlined_call_operand.vmem [shape: f32[256,128], index: 3, kind: input, shape index: {}]   ;;  %s627_s0 = inlined_call_operand.vmem [shape: f32[16,128], index: 0, kind: input, shape index: {}]   ;;  %s628_s2 = inlined_call_operand.vmem [shape: f32[1,256], index: 2, kind: input, shape index: {}]   ;;  %s629_s4 = inlined_call_operand.vmem [shape: f32[1,128], index: 4, kind: input, shape index: {}]   ;;  %s630_s5 = inlined_call_operand.vmem [shape: f32[1,128], index: 5, kind: input, shape index: {}]   ;;  %s631_s6 = inlined_call_operand.vmem [shape: f32[1,128], index: 6, kind: input, shape index: {}]   ;;  %s632_s7 = inlined_call_operand.vmem [shape: f32[16,128], index: 7, kind: output, shape index: {}]  }
   0x1   :  { %v59_v0 = vld [vmem:[%s625_s1 + $0xf8] sm:$0xff]  ;;  %v58_v1 = vld [vmem:[%s625_s1 + $0xf0] sm:$0xff]  ;;  %v57_v2 = vld [vmem:[%s625_s1 + $0xe8] sm:$0xff]  ;;  %136 = vmatprep.mubr.f32.mxu0 %v362_v3 }
   0x2   :  { %72 = vmatprep.subr.mxu0 %v59_v0  ;;  %v56_v4 = vld [vmem:[%s625_s1 + $0xe0] sm:$0xff]  ;;  %v55_v5 = vld [vmem:[%s625_s1 + $0xd8] sm:$0xff]  ;;  %v54_v6 = vld [vmem:[%s625_s1 + $0xd0] sm:$0xff] }
   0x3   :  { %73 = vmatpush1.msra.mxu0 %v58_v1  ;;  %v53_v7 = vld [vmem:[%s625_s1 + $0xc8] sm:$0xff]  ;;  %v52_v8 = vld [vmem:[%s625_s1 + $0xc0] sm:$0xff]  ;;  %v51_v9 = vld [vmem:[%s625_s1 + $0xb8] sm:$0xff] }
   0x4   :  { %74 = vmatprep.subr.mxu0 %v57_v2  ;;  %v50_v10 = vld [vmem:[%s625_s1 + $0xb0] sm:$0xff]  ;;  %v49_v11 = vld [vmem:[%s625_s1 + $0xa8] sm:$0xff]  ;;  %v48_v12 = vld [vmem:[%s625_s1 + $0xa0] sm:$0xff] }
   0x5   :  { %75 = vmatpush1.msra.mxu0 %v56_v4  ;;  %v47_v13 = vld [vmem:[%s625_s1 + $0x98] sm:$0xff]  ;;  %v46_v14 = vld [vmem:[%s625_s1 + $0x90] sm:$0xff]  ;;  %v45_v17 = vld [vmem:[%s625_s1 + $0x88] sm:$0xff] }
   0x6   :  { %76 = vmatprep.subr.mxu0 %v55_v5  ;;  %v184_v15 = vld [vmem:[%s626_s3 + $0xf8] sm:$0xff]  ;;  %v183_v18 = vld [vmem:[%s626_s3 + $0xf0] sm:$0xff]  ;;  %v44_v20 = vld [vmem:[%s625_s1 + $0x80] sm:$0xff] }
   0x7   :  { %77 = vmatpush1.msra.mxu0 %v54_v6  ;;  %v168_v16 = vld [vmem:[%s626_s3 + $0x78] sm:$0xff]  ;;  %319 = vmatprep.subr.mxu1 %v184_v15  ;;  %v167_v19 = vld [vmem:[%s626_s3 + $0x70] sm:$0xff]  ;;  %v182_v21 = vld [vmem:[%s626_s3 + $0xe8] sm:$0xff] }
   0x8   :  { %78 = vmatprep.subr.mxu0 %v53_v7  ;;  %320 = vmatpush3.msra.mxu1 %v168_v16  ;;  %v43_v22 = vld [vmem:[%s625_s1 + $0x78] sm:$0xff]  ;;  %v166_v23 = vld [vmem:[%s626_s3 + $0x68] sm:$0xff]  ;;  %v42_v24 = vld [vmem:[%s625_s1 + $0x70] sm:$0xff] }
   0x9   :  { %79 = vmatpush1.msra.mxu0 %v52_v8  ;;  %321 = vmatprep.subr.mxu1 %v183_v18  ;;  %v181_v25 = vld [vmem:[%s626_s3 + $0xe0] sm:$0xff]  ;;  %v41_v26 = vld [vmem:[%s625_s1 + $0x68] sm:$0xff]  ;;  %v180_v29 = vld [vmem:[%s626_s3 + $0xd8] sm:$0xff] }
   0xa   :  { %80 = vmatprep.subr.mxu0 %v51_v9  ;;  %322 = vmatpush3.msra.mxu1 %v167_v19  ;;  %v165_v27 = vld [vmem:[%s626_s3 + $0x60] sm:$0xff]  ;;  %v39_v30 = vld [vmem:[%s625_s1 + $0x58] sm:$0xff]  ;;  %v38_v32 = vld [vmem:[%s625_s1 + $0x50] sm:$0xff] }
   0xb   :  { %81 = vmatpush1.msra.mxu0 %v50_v10  ;;  %323 = vmatprep.subr.mxu1 %v182_v21  ;;  %v40_v28 = vld [vmem:[%s625_s1 + $0x60] sm:$0xff]  ;;  %v164_v31 = vld [vmem:[%s626_s3 + $0x58] sm:$0xff]  ;;  %v179_v33 = vld [vmem:[%s626_s3 + $0xd0] sm:$0xff] }
   0xc   :  { %82 = vmatprep.subr.mxu0 %v49_v11  ;;  %324 = vmatpush3.msra.mxu1 %v166_v23  ;;  %v37_v34 = vld [vmem:[%s625_s1 + $0x48] sm:$0xff]  ;;  %v163_v35 = vld [vmem:[%s626_s3 + $0x50] sm:$0xff]  ;;  %v36_v36 = vld [vmem:[%s625_s1 + $0x40] sm:$0xff] }
   0xd   :  { %83 = vmatpush1.msra.mxu0 %v48_v12  ;;  %325 = vmatprep.subr.mxu1 %v181_v25  ;;  %v178_v37 = vld [vmem:[%s626_s3 + $0xc8] sm:$0xff]  ;;  %v35_v38 = vld [vmem:[%s625_s1 + $0x38] sm:$0xff]  ;;  %v34_v40 = vld [vmem:[%s625_s1 + $0x30] sm:$0xff] }
   0xe   :  { %84 = vmatprep.subr.mxu0 %v47_v13  ;;  %326 = vmatpush3.msra.mxu1 %v165_v27  ;;  %v162_v39 = vld [vmem:[%s626_s3 + $0x48] sm:$0xff]  ;;  %v177_v41 = vld [vmem:[%s626_s3 + $0xc0] sm:$0xff]  ;;  %v176_v45 = vld [vmem:[%s626_s3 + $0xb8] sm:$0xff] }
   0xf   :  { %85 = vmatpush1.msra.mxu0 %v46_v14  ;;  %327 = vmatprep.subr.mxu1 %v180_v29  ;;  %v33_v42 = vld [vmem:[%s625_s1 + $0x28] sm:$0xff]  ;;  %v161_v43 = vld [vmem:[%s626_s3 + $0x40] sm:$0xff]  ;;  %v31_v46 = vld [vmem:[%s625_s1 + $0x18] sm:$0xff] }
  0x10   :  { %86 = vmatprep.subr.mxu0 %v45_v17  ;;  %328 = vmatpush3.msra.mxu1 %v164_v31  ;;  %v32_v44 = vld [vmem:[%s625_s1 + $0x20] sm:$0xff]  ;;  %v160_v47 = vld [vmem:[%s626_s3 + $0x38] sm:$0xff]  ;;  %v30_v48 = vld [vmem:[%s625_s1 + $0x10] sm:$0xff] }
  0x11   :  { %87 = vmatpush1.msra.mxu0 %v44_v20  ;;  %329 = vmatprep.subr.mxu1 %v179_v33  ;;  %v175_v49 = vld [vmem:[%s626_s3 + $0xb0] sm:$0xff]  ;;  %v29_v50 = vld [vmem:[%s625_s1 + $0x8] sm:$0xff]  ;;  %v28_v52 = vld [vmem:[%s625_s1] sm:$0xff] }
  0x12   :  { %88 = vmatprep.subr.mxu0 %v43_v22  ;;  %330 = vmatpush3.msra.mxu1 %v163_v35  ;;  %v159_v51 = vld [vmem:[%s626_s3 + $0x30] sm:$0xff]  ;;  %v174_v53 = vld [vmem:[%s626_s3 + $0xa8] sm:$0xff]  ;;  %v566_v54 = vld [vmem:[%s627_s0] sm:$0xff] }
  0x13   :  { %89 = vmatpush1.msra.mxu0 %v42_v24  ;;  %331 = vmatprep.subr.mxu1 %v178_v37  ;;  %v158_v55 = vld [vmem:[%s626_s3 + $0x28] sm:$0xff]  ;;  %v173_v56 = vld [vmem:[%s626_s3 + $0xa0] sm:$0xff]  ;;  %v172_v59 = vld [vmem:[%s626_s3 + $0x98] sm:$0xff] }
  0x14   :  { %90 = vmatprep.subr.mxu0 %v41_v26  ;;  %332 = vmatpush3.msra.mxu1 %v162_v39  ;;  %v157_v57 = vld [vmem:[%s626_s3 + $0x20] sm:$0xff]  ;;  %v27_v58 = vld [vmem:[%s627_s0 + $0x8] sm:$0xff]  ;;  %v156_v60 = vld [vmem:[%s626_s3 + $0x18] sm:$0xff] }
  0x15   :  { %91 = vmatpush1.msra.mxu0 %v40_v28  ;;  %333 = vmatprep.subr.mxu1 %v177_v41  ;;  %v171_v61 = vld [vmem:[%s626_s3 + $0x90] sm:$0xff]  ;;  %v170_v63 = vld [vmem:[%s626_s3 + $0x88] sm:$0xff]  ;;  %v169_v1 = vld [vmem:[%s626_s3 + $0x80] sm:$0xff] }
  0x16   :  { %92 = vmatprep.subr.mxu0 %v39_v30  ;;  %334 = vmatpush3.msra.mxu1 %v161_v43  ;;  %v155_v62 = vld [vmem:[%s626_s3 + $0x10] sm:$0xff]  ;;  %v154_v0 = vld [vmem:[%s626_s3 + $0x8] sm:$0xff]  ;;  %v153_v2 = vld [vmem:[%s626_s3] sm:$0xff] }
  0x17   :  { %93 = vmatpush1.msra.mxu0 %v38_v32  ;;  %335 = vmatprep.subr.mxu1 %v176_v45  ;;  %v60_v6 = vld [vmem:[%s628_s2] sm:$0x3] }
  0x18   :  { %94 = vmatprep.subr.mxu0 %v37_v34  ;;  %336 = vmatpush3.msra.mxu1 %v160_v47  ;;  %v316_v23 = vld [vmem:[%s629_s4] ss:$0 sm:$0xff] }
  0x19   :  { %95 = vmatpush1.msra.mxu0 %v36_v36  ;;  %337 = vmatprep.subr.mxu1 %v175_v49 }
  0x1a   :  { %96 = vmatprep.subr.mxu0 %v35_v38  ;;  %338 = vmatpush3.msra.mxu1 %v159_v51 }
  0x1b   :  { %97 = vmatpush1.msra.mxu0 %v34_v40  ;;  %339 = vmatprep.subr.mxu1 %v174_v53 }
  0x1c   :  { %98 = vmatprep.subr.mxu0 %v33_v42  ;;  %340 = vmatpush3.msra.mxu1 %v158_v55 }
  0x1d   :  { %99 = vmatpush1.msra.mxu0 %v32_v44  ;;  %341 = vmatprep.subr.mxu1 %v173_v56 }
  0x1e   :  { %100 = vmatprep.subr.mxu0 %v31_v46  ;;  %342 = vmatpush3.msra.mxu1 %v157_v57 }
  0x1f   :  { %101 = vmatpush1.msra.mxu0 %v30_v48  ;;  %343 = vmatprep.subr.mxu1 %v172_v59  ;;  %v317_v48 = vld [vmem:[%s630_s5] ss:$0 sm:$0xff] }
  0x20   :  { %102 = vmatprep.subr.mxu0 %v29_v50  ;;  %344 = vmatpush3.msra.mxu1 %v156_v60  ;;  %v318_v50 = vld [vmem:[%s631_s6] ss:$0 sm:$0xff] }
  0x21   :  { %103 = vmatpush1.msra.mxu0 %v28_v52  ;;  %345 = vmatprep.subr.mxu1 %v171_v61 }
  0x22   :  { %137 = vmatmul.mubr.f32.vlgmr.msra.gmra.mxu0 %v566_v54  ;;  %346 = vmatpush3.msra.mxu1 %v155_v62 }
  0x23   :  { %142 = vmatprep.mubr.f32.mxu0 %v362_v3  ;;  %347 = vmatprep.subr.mxu1 %v170_v63  ;;  %v62_v3 = vlaneseq }
  0x24   :  { %348 = vmatpush3.msra.mxu1 %v154_v0 }
  0x25   :  { %349 = vmatprep.subr.mxu1 %v169_v1  ;;  %v63_v4 = vshrl.u32 %v62_v3, 7 }
  0x26   :  { %143 = vmatmul.mubr.f32.gmra.mxu0 %v27_v58  ;;  %350 = vmatpush3.msra.mxu1 %v153_v2 }
  0x27   :  { %v64_v5 = vsub.s32 0, %v63_v4  ;;  %v68_v7 = vsub.s32 1, %v63_v4 }
  0x29   :  { %v65_v8 = vrot.slane %v60_v6, %v64_v5  ;;  %v69_v9 = vrot.slane %v60_v6, %v68_v7 }
  0xe2   :  { %v138_v10 = vpop.f32.mrf.mxu0 }
  0xe3   :  { %v139_v11 = vadd.f32 %v138_v10, %v65_v8 }
  0xe4   :  { %v140_v12 = vpop.f32.mrf.mxu0 }
  0xe5   :  { %v141_v13 = vadd.f32 %v140_v12, %v69_v9  ;;  %v149_v16 = vmax.f32 %v139_v11, 0.0 }
  0xe6   :  { %v144_v14 = vpop.f32.mrf.mxu0 }
  0xe7   :  { %v150_v15 = vmax.f32 %v141_v13, 0.0  ;;  %v145_v17 = vadd.f32 %v144_v14, %v65_v8 }
  0xe8   :  { %v146_v18 = vpop.f32.mrf.mxu0 }
  0xe9   :  { %v147_v19 = vadd.f32 %v146_v18, %v69_v9  ;;  %256 = vmatprep.mubr.f32.mxu1 %v150_v15  ;;  %v151_v21 = vmax.f32 %v145_v17, 0.0 }
  0xea   :  { %257 = vmatmul.mubr.f32.vlgmr.msra.gmra.mxu1 %v149_v16 }
  0xeb   :  { %v152_v20 = vmax.f32 %v147_v19, 0.0 }
  0xed   :  { %261 = vmatprep.mubr.f32.mxu1 %v152_v20 }
  0xee   :  { %262 = vmatmul.mubr.f32.gmra.mxu1 %v151_v21 }
 0x1aa   :  { %v351_v22 = vpop.f32.mrf.mxu1 }
 0x1ac   :  { %v352_v24 = vpop.f32.mrf.mxu1 }
 0x1ad   :  { %v353_v25 = vadd.f32 %v352_v24, %v351_v22 }
 0x1ae   :  { %v354_v26 = vpop.f32.mrf.mxu1 }
 0x1af   :  { %v259_v27 = vadd.f32 %v353_v25, %v316_v23 }
 0x1b0   :  { %v355_v28 = vpop.f32.mrf.mxu1 }
 0x1b1   :  { %v356_v29 = vadd.f32 %v355_v28, %v354_v26  ;;  %v267_v30 = vadd.f32 %v259_v27, %v566_v54 }
 0x1b3   :  { %v264_v31 = vadd.f32 %v356_v29, %v316_v23  ;;  %269 = vadd.xlane.f32.xlu0 %v267_v30 }
 0x1b5   :  { %v268_v32 = vadd.f32 %v264_v31, %v27_v58 }
 0x1b7   :  { %271 = vadd.xlane.f32.xlu0 %v268_v32 }
 0x23c   :  { %v270_v33 = vpop.xlane.xlu0 %269 }
 0x23d   :  { %v274_v34 = vmul.f32 0.0078125, %v270_v33 }
 0x23f   :  { %v276_v35 = vsub.f32 %v267_v30, %v274_v34 }
 0x240   :  { %v272_v36 = vpop.xlane.xlu0 %271 }
 0x241   :  { %v275_v37 = vmul.f32 0.0078125, %v272_v36  ;;  %v278_v38 = vmul.f32 %v276_v35, %v276_v35 }
 0x243   :  { %v277_v39 = vsub.f32 %v268_v32, %v275_v37  ;;  %280 = vadd.xlane.f32.xlu1 %v278_v38 }
 0x245   :  { %v279_v40 = vmul.f32 %v277_v39, %v277_v39 }
 0x247   :  { %282 = vadd.xlane.f32.xlu1 %v279_v40 }
 0x2cc   :  { %v281_v41 = vpop.xlane.xlu1 %280 }
 0x2cd   :  { %v284_v42 = vmul.f32 0.0078125, %v281_v41 }
 0x2cf   :  { %v286_v43 = vadd.f32 1e-05, %v284_v42 }
 0x2d0   :  { %v283_v44 = vpop.xlane.xlu1 %282 }
 0x2d1   :  { %358 = vrsqrt.f32 %v286_v43  ;;  %v285_v45 = vmul.f32 0.0078125, %v283_v44 }
 0x2d3   :  { %v287_v46 = vadd.f32 1e-05, %v285_v45 }
 0x2d5   :  { %360 = vrsqrt.f32 %v287_v46 }
 0x2de   :  { %v359_v47 = vpop.eup %358 }
 0x2df   :  { %v290_v49 = vmul.f32 %v359_v47, %v276_v35 }
 0x2e1   :  { %v299_v51 = vmul.f32 %v317_v48, %v290_v49 }
 0x2e2   :  { %v361_v52 = vpop.eup %360 }
 0x2e3   :  { %v308_v53 = vadd.f32 %v318_v50, %v299_v51  ;;  %v291_v54 = vmul.f32 %v361_v52, %v277_v39 }
 0x2e5   :  { %310 = vst [vmem:[%s632_s7] sm:$0xff] %v308_v53  ;;  %v300_v55 = vmul.f32 %v317_v48, %v291_v54 }
 0x2e7   :  { %v309_v56 = vadd.f32 %v318_v50, %v300_v55 }
 0x2e9   :  { %311 = vst [vmem:[%s632_s7 + $0x8] sm:$0xff] %v309_v56 }

// kernel: seq2seq_transformer_forward.25
= control target key start
LH: loop header
LB: loop body
LE: loop exit
PB: predicated region body
PF: predicated region fallthrough
CT: control target
= control target key end

     0   :  { %s295_s0 = inlined_call_operand.vmem [shape: f32[16,128], index: 0, kind: input, shape index: {}]   ;;  %s296_s1 = inlined_call_operand.vmem [shape: f32[128,128], index: 1, kind: input, shape index: {}]   ;;  %s297_s2 = inlined_call_operand.vmem [shape: f32[1,128], index: 2, kind: input, shape index: {}]   ;;  %s298_s3 = inlined_call_operand.hbm [shape: f32[16,128], index: 3, kind: output, shape index: {}]  }
   0x1   :  { %v32_v0 = vld [vmem:[%s296_s1 + $0x78] sm:$0xff]  ;;  %v31_v1 = vld [vmem:[%s296_s1 + $0x70] sm:$0xff]  ;;  %v30_v2 = vld [vmem:[%s296_s1 + $0x68] sm:$0xff] }
   0x2   :  { %152 = vmatprep.subr.mxu0 %v32_v0  ;;  %v29_v3 = vld [vmem:[%s296_s1 + $0x60] sm:$0xff]  ;;  %v28_v5 = vld [vmem:[%s296_s1 + $0x58] sm:$0xff] }
   0x3   :  { %153 = vmatpush3.msra.mxu0 %v32_v0  ;;  %v15_v4 = vld [vmem:[%s295_s0] sm:$0xff] }
   0x4   :  { %154 = vmatprep.subr.mxu0 %v31_v1  ;;  %184 = vmatprep.mubr.f32.mxu0 %v15_v4 }
   0x5   :  { %155 = vmatpush3.msra.mxu0 %v31_v1 }
   0x6   :  { %156 = vmatprep.subr.mxu0 %v30_v2 }
   0x7   :  { %157 = vmatpush3.msra.mxu0 %v30_v2 }
   0x8   :  { %8 = vsyncpa [#allocation3], 0  ;;  %158 = vmatprep.subr.mxu0 %v29_v3  ;;  %v27_v6 = vld [vmem:[%s296_s1 + $0x50] sm:$0xff]  ;;  %v26_v7 = vld [vmem:[%s296_s1 + $0x48] sm:$0xff]  ;;  %s212_s23 = smov [#allocation2]  }
   0x9   :  { %159 = vmatpush3.msra.mxu0 %v29_v3  ;;  %v25_v8 = vld [vmem:[%s296_s1 + $0x40] sm:$0xff]  ;;  %v24_v9 = vld [vmem:[%s296_s1 + $0x38] sm:$0xff]  ;;  %v23_v10 = vld [vmem:[%s296_s1 + $0x30] sm:$0xff]  ;;  %s122_s24 = sshll.u32 %s212_s23, 4  ;;  %s123_s24 = int_to_ptr.vmem [resolvable:$true] %s122_s24 }
   0xa   :  { %160 = vmatprep.subr.mxu0 %v28_v5  ;;  %v22_v11 = vld [vmem:[%s296_s1 + $0x28] sm:$0xff]  ;;  %v21_v12 = vld [vmem:[%s296_s1 + $0x20] sm:$0xff]  ;;  %v20_v13 = vld [vmem:[%s296_s1 + $0x18] sm:$0xff]  ;;  %p195_p1 = scmp.lt.s32.totalorder %s123_s24, %s123_s24 }
   0xb   :  { %161 = vmatpush3.msra.mxu0 %v28_v5  ;;  %v19_v14 = vld [vmem:[%s296_s1 + $0x10] sm:$0xff]  ;;  %v18_v15 = vld [vmem:[%s296_s1 + $0x8] sm:$0xff]  ;;  %v17_v16 = vld [vmem:[%s296_s1] sm:$0xff]  ;;  %s190_s1 = scalar_lea.vmem %s123_s24, 256 }
   0xc   :  { %162 = vmatprep.subr.mxu0 %v27_v6  ;;  %v16_v17 = vld [vmem:[%s295_s0 + $0x8] sm:$0xff]  ;;  %v133_v18 = vld [vmem:[%s297_s2] ss:$0 sm:$0xff]  ;;  %p191_p0 = scmp.ne.s32.totalorder %s123_s24, %s190_s1  ;;  %p196_p2 = scmp.lt.s32.totalorder %s190_s1, %s190_s1 }
   0xd   :  { %163 = vmatpush3.msra.mxu0 %v27_v6 }
   0xe   :  { %164 = vmatprep.subr.mxu0 %v26_v7  ;;  %p197_p3 = por %p196_p2, %p195_p1 }
   0xf   :  { %165 = vmatpush3.msra.mxu0 %v26_v7 }
  0x10   :  { %166 = vmatprep.subr.mxu0 %v25_v8  ;;  %p198_p4 = pnand %p197_p3, %p191_p0 }
  0x11   :  { %167 = vmatpush3.msra.mxu0 %v25_v8 }
  0x12   :  { %168 = vmatprep.subr.mxu0 %v24_v9 }
  0x13   :  { %169 = vmatpush3.msra.mxu0 %v24_v9 }
  0x14   :  { %170 = vmatprep.subr.mxu0 %v23_v10 }
  0x15   :  { %171 = vmatpush3.msra.mxu0 %v23_v10 }
  0x16   :  { %172 = vmatprep.subr.mxu0 %v22_v11 }
  0x17   :  { %173 = vmatpush3.msra.mxu0 %v22_v11 }
  0x18   :  { %174 = vmatprep.subr.mxu0 %v21_v12 }
  0x19   :  { %175 = vmatpush3.msra.mxu0 %v21_v12 }
  0x1a   :  { %176 = vmatprep.subr.mxu0 %v20_v13 }
  0x1b   :  { %177 = vmatpush3.msra.mxu0 %v20_v13 }
  0x1c   :  { %178 = vmatprep.subr.mxu0 %v19_v14 }
  0x1d   :  { %179 = vmatpush3.msra.mxu0 %v19_v14 }
  0x1e   :  { %180 = vmatprep.subr.mxu0 %v18_v15 }
  0x1f   :  { %181 = vmatpush3.msra.mxu0 %v18_v15 }
  0x20   :  { %182 = vmatprep.subr.mxu0 %v17_v16 }
  0x21   :  { %183 = vmatpush3.msra.mxu0 %v17_v16 }
  0x22   :  { %185 = vmatmul.mubr.f32.vlgmr.msra.gmra.mxu0 %v16_v17 }
  0xe2   :  { %v186_v19 = vpop.f32.mrf.mxu0 }
  0xe3   :  { %v112_v20 = vadd.f32 %v186_v19, %v133_v18 }
  0xe4   :  { %v106_v21 = vpop.f32.mrf.mxu0 }
  0xe5   :  { %116 = vst [vmem:[#allocation2 + $0x8] sm:$0xff] %v112_v20  ;;  %v107_v22 = vadd.f32 %v133_v18, %v106_v21 }
  0xe7   :  { %115 = vst [vmem:[#allocation2] sm:$0xff] %v107_v22 }
  0xe8   :  { %201 = shalt.err (!%p198_p4)
}
  0xe9   :  { %s213_s0 = smov 128   ;;  %s214_s25 = smov 8  }
  0xea   :  { %128 = dma.vmem_to_hbm [thread:$0]  %s123_s24, 256, %s298_s3, [#allocation3], %s213_s0, %s213_s0, %s214_s25  }
  0xeb   :  { %210 = dma.done.wait [#allocation3], 256  }
  0xec   :  { %211 = vsyncadd [#allocation3], 4294967040 }
  0xed   :  { %132 = vsyncpa [#allocation3], 1 }

// kernel: seq2seq_transformer_forward.15
= control target key start
LH: loop header
LB: loop body
LE: loop exit
PB: predicated region body
PF: predicated region fallthrough
CT: control target
= control target key end

     0   :  { %s3747_s25 = smov 0   ;;  %s4784_s0 = inlined_call_operand.vmem [shape: f32[2,8,128], index: 0, kind: input, shape index: {}, may-alias: {0,1}]   ;;  %s4785_s1 = inlined_call_operand.vmem [shape: f32[2,8,128], index: 1, kind: input, shape index: {}, may-alias: {0,1}]   ;;  %s4786_s2 = inlined_call_operand.vmem [shape: f32[4,128,32], index: 2, kind: input, shape index: {}]   ;;  %s4787_s3 = inlined_call_operand.vmem [shape: f32[4,128,32], index: 3, kind: input, shape index: {}]   ;;  %s4788_s4 = inlined_call_operand.vmem [shape: f32[4,128,32], index: 4, kind: input, shape index: {}]   ;;  %s4789_s5 = inlined_call_operand.vmem [shape: f32[4,32,128], index: 5, kind: input, shape index: {}]   ;;  %s4790_s6 = inlined_call_operand.vmem [shape: f32[4,1,32], index: 6, kind: input, shape index: {}]   ;;  %s4791_s7 = inlined_call_operand.vmem [shape: f32[4,1,32], index: 7, kind: input, shape index: {}]   ;;  %s4792_s8 = inlined_call_operand.vmem [shape: f32[4,1,32], index: 8, kind: input, shape index: {}]   ;;  %s4793_s9 = inlined_call_operand.vmem [shape: f32[1,128], index: 9, kind: input, shape index: {}]   ;;  %s4794_s10 = inlined_call_operand.vmem [shape: f32[2,8,8], index: 10, kind: input, shape index: {}]   ;;  %s4795_s11 = inlined_call_operand.vmem [shape: f32[1,128], index: 11, kind: input, shape index: {}]   ;;  %s4796_s12 = inlined_call_operand.vmem [shape: f32[1,128], index: 12, kind: input, shape index: {}]   ;;  %s4797_s13 = inlined_call_operand.vmem [shape: f32[2,8,128], index: 13, kind: output, shape index: {}]  }
   0x1 LB: > { %s2685_s26 = sadd.s32 4294967295, %s3673_s25   ;;  %p2689_p0 = scmp.ge.s32.totalorder %s3673_s25, 1  ;;  %s3673_s25 = sphi %s3747_s25, %s23_s25  }
   0x2   : > { %p404_p1 = scmp.lt.s32.totalorder %s3673_s25, 3 }
   0x4   : > { %p405_p2 = pnand %p2689_p0, %p404_p1 }
   0x5   : > { %p454_p3 = scmp.lt.s32.totalorder (!%p405_p2), %s2685_s26, 1 }
   0x6   : > { %408 = sbr.rel (%p405_p2) target bundleno = 4044 (0xfcc), region = 72 }
   0xb   : > { %v581_v0 = vld [vmem:[%s4787_s3 + $0x78] sm:$0xff]  ;;  %v3675_v2 = vmov 0.0   ;;  %v580_v3 = vld [vmem:[%s4787_s3 + $0x70] sm:$0xff]  ;;  %v579_v5 = vld [vmem:[%s4787_s3 + $0x68] sm:$0xff]  ;;  %s4799_s26 = smov (!%p454_p3, %s2685_s26), 1  ;;  %vm3676_vm0 = vmmov 0  }
   0xc   : > { %v488_v1 = vld [vmem:[%s4786_s2 + $0x78] sm:$0xff]  ;;  %3167 = vmatprep.subr.mxu1 %v3675_v2  ;;  %3132 = vmatprep.subr.mxu0 %v3675_v2  ;;  %v487_v4 = vld [vmem:[%s4786_s2 + $0x70] sm:$0xff]  ;;  %v486_v6 = vld [vmem:[%s4786_s2 + $0x68] sm:$0xff]  ;;  %s3861_s17 = sshll.u32 %s4799_s26, 3  ;;  %vm752_vm1 = vcmask 261120   ;;  %vm831_vm2 = vcmask 64512  }
   0xd   : > { %3168 = vmatpush3.msra.mxu1 %v581_v0  ;;  %3133 = vmatpush3.msra.mxu0 %v488_v1  ;;  %v578_v7 = vld [vmem:[%s4787_s3 + $0x60] sm:$0xff]  ;;  %v577_v9 = vld [vmem:[%s4787_s3 + $0x58] sm:$0xff]  ;;  %v576_v11 = vld [vmem:[%s4787_s3 + $0x50] sm:$0xff]  ;;  %s3883_s29 = scalar_lea.vmem %s4785_s1, %s3861_s17  ;;  %s3894_s18 = scalar_lea.vmem %s4784_s0, %s3861_s17 }
   0xe   : > { %3169 = vmatprep.subr.mxu1 %v3675_v2  ;;  %3134 = vmatprep.subr.mxu0 %v3675_v2  ;;  %v485_v8 = vld [vmem:[%s4786_s2 + $0x60] sm:$0xff]  ;;  %v484_v10 = vld [vmem:[%s4786_s2 + $0x58] sm:$0xff]  ;;  %v483_v12 = vld [vmem:[%s4786_s2 + $0x50] sm:$0xff]  ;;  %s4001_s20 = scalar_lea.vmem %s4794_s10, %s3861_s17  ;;  %s469_s21 = scalar_lea.vmem %s4797_s13, %s3861_s17 }
   0xf   : > { %3170 = vmatpush3.msra.mxu1 %v580_v3  ;;  %3135 = vmatpush3.msra.mxu0 %v487_v4  ;;  %v575_v13 = vld [vmem:[%s4787_s3 + $0x48] sm:$0xff]  ;;  %v574_v15 = vld [vmem:[%s4787_s3 + $0x40] sm:$0xff]  ;;  %v573_v17 = vld [vmem:[%s4787_s3 + $0x38] sm:$0xff] }
  0x10   : > { %3171 = vmatprep.subr.mxu1 %v3675_v2  ;;  %3136 = vmatprep.subr.mxu0 %v3675_v2  ;;  %v482_v14 = vld [vmem:[%s4786_s2 + $0x48] sm:$0xff]  ;;  %v481_v16 = vld [vmem:[%s4786_s2 + $0x40] sm:$0xff]  ;;  %v480_v18 = vld [vmem:[%s4786_s2 + $0x38] sm:$0xff] }
  0x11   : > { %3172 = vmatpush3.msra.mxu1 %v579_v5  ;;  %3137 = vmatpush3.msra.mxu0 %v486_v6  ;;  %v572_v19 = vld [vmem:[%s4787_s3 + $0x30] sm:$0xff]  ;;  %v571_v21 = vld [vmem:[%s4787_s3 + $0x28] sm:$0xff]  ;;  %v570_v23 = vld [vmem:[%s4787_s3 + $0x20] sm:$0xff] }
  0x12   : > { %3173 = vmatprep.subr.mxu1 %v3675_v2  ;;  %3138 = vmatprep.subr.mxu0 %v3675_v2  ;;  %v479_v20 = vld [vmem:[%s4786_s2 + $0x30] sm:$0xff]  ;;  %v478_v22 = vld [vmem:[%s4786_s2 + $0x28] sm:$0xff]  ;;  %v477_v24 = vld [vmem:[%s4786_s2 + $0x20] sm:$0xff] }
  0x13   : > { %3174 = vmatpush3.msra.mxu1 %v578_v7  ;;  %3139 = vmatpush3.msra.mxu0 %v485_v8  ;;  %v569_v25 = vld [vmem:[%s4787_s3 + $0x18] sm:$0xff]  ;;  %v568_v27 = vld [vmem:[%s4787_s3 + $0x10] sm:$0xff]  ;;  %v567_v29 = vld [vmem:[%s4787_s3 + $0x8] sm:$0xff] }
  0x14   : > { %3175 = vmatprep.subr.mxu1 %v3675_v2  ;;  %3140 = vmatprep.subr.mxu0 %v3675_v2  ;;  %v476_v26 = vld [vmem:[%s4786_s2 + $0x18] sm:$0xff]  ;;  %v475_v28 = vld [vmem:[%s4786_s2 + $0x10] sm:$0xff]  ;;  %v474_v30 = vld [vmem:[%s4786_s2 + $0x8] sm:$0xff] }
  0x15   : > { %3176 = vmatpush3.msra.mxu1 %v577_v9  ;;  %3141 = vmatpush3.msra.mxu0 %v484_v10  ;;  %v566_v31 = vld [vmem:[%s4787_s3] sm:$0xff]  ;;  %v674_v43 = vld [vmem:[%s4788_s4 + $0x78] sm:$0xff]  ;;  %v673_v44 = vld [vmem:[%s4788_s4 + $0x70] sm:$0xff] }
  0x16   : > { %3177 = vmatprep.subr.mxu1 %v3675_v2  ;;  %3142 = vmatprep.subr.mxu0 %v3675_v2  ;;  %v3897_v32 = vld [vmem:[%s3883_s29] sm:$0xff]  ;;  %v672_v45 = vld [vmem:[%s4788_s4 + $0x68] sm:$0xff]  ;;  %v670_v47 = vld [vmem:[%s4788_s4 + $0x58] sm:$0xff] }
  0x17   : > { %3178 = vmatpush3.msra.mxu1 %v576_v11  ;;  %3143 = vmatpush3.msra.mxu0 %v483_v12  ;;  %v473_v33 = vld [vmem:[%s4786_s2] sm:$0xff]  ;;  %v669_v48 = vld [vmem:[%s4788_s4 + $0x50] sm:$0xff]  ;;  %v668_v49 = vld [vmem:[%s4788_s4 + $0x48] sm:$0xff] }
  0x18   : > { %3179 = vmatprep.subr.mxu1 %v3675_v2  ;;  %3144 = vmatprep.subr.mxu0 %v3675_v2  ;;  %v3907_v34 = vld [vmem:[%s3894_s18] sm:$0xff]  ;;  %v666_v51 = vld [vmem:[%s4788_s4 + $0x38] sm:$0xff]  ;;  %v665_v52 = vld [vmem:[%s4788_s4 + $0x30] sm:$0xff] }
  0x19   : > { %3180 = vmatpush3.msra.mxu1 %v575_v13  ;;  %3145 = vmatpush3.msra.mxu0 %v482_v14  ;;  %v2695_v35 = vld [vmem:[%s4791_s7] ss:$0 sm:$0xff]  ;;  %v664_v53 = vld [vmem:[%s4788_s4 + $0x28] sm:$0xff]  ;;  %v662_v55 = vld [vmem:[%s4788_s4 + $0x18] sm:$0xff] }
  0x1a   : > { %3181 = vmatprep.subr.mxu1 %v3675_v2  ;;  %3146 = vmatprep.subr.mxu0 %v3675_v2  ;;  %v2694_v37 = vld [vmem:[%s4790_s6] ss:$0 sm:$0xff]  ;;  %v661_v56 = vld [vmem:[%s4788_s4 + $0x10] sm:$0xff]  ;;  %v660_v57 = vld [vmem:[%s4788_s4 + $0x8] sm:$0xff] }
  0x1b   : > { %3182 = vmatpush3.msra.mxu1 %v574_v15  ;;  %3147 = vmatpush3.msra.mxu0 %v481_v16  ;;  %v671_v46 = vld [vmem:[%s4788_s4 + $0x60] sm:$0xff]  ;;  %v2733_v9 = vld [vmem:[%s4787_s3 + $0xf8] sm:$0xff]  ;;  %v2732_v10 = vld [vmem:[%s4787_s3 + $0xf0] sm:$0xff] }
  0x1c   : > { %3183 = vmatprep.subr.mxu1 %v3675_v2  ;;  %3148 = vmatprep.subr.mxu0 %v3675_v2  ;;  %v667_v50 = vld [vmem:[%s4788_s4 + $0x40] sm:$0xff]  ;;  %v2731_v13 = vld [vmem:[%s4787_s3 + $0xe8] sm:$0xff]  ;;  %v2729_v15 = vld [vmem:[%s4787_s3 + $0xd8] sm:$0xff] }
  0x1d   : > { %3184 = vmatpush3.msra.mxu1 %v573_v17  ;;  %3149 = vmatpush3.msra.mxu0 %v480_v18  ;;  %v663_v54 = vld [vmem:[%s4788_s4 + $0x20] sm:$0xff]  ;;  %v2728_v16 = vld [vmem:[%s4787_s3 + $0xd0] sm:$0xff]  ;;  %v2727_v17 = vld [vmem:[%s4787_s3 + $0xc8] sm:$0xff] }
  0x1e   : > { %3185 = vmatprep.subr.mxu1 %v3675_v2  ;;  %3150 = vmatprep.subr.mxu0 %v3675_v2  ;;  %v659_v58 = vld [vmem:[%s4788_s4] sm:$0xff] }
  0x1f   : > { %3186 = vmatpush3.msra.mxu1 %v572_v19  ;;  %3151 = vmatpush3.msra.mxu0 %v479_v20  ;;  %v4004_v60 = vld [vmem:[%s4001_s20] sm:$0xff]  ;;  %v2725_v19 = vld [vmem:[%s4787_s3 + $0xb8] sm:$0xff]  ;;  %v2724_v20 = vld [vmem:[%s4787_s3 + $0xb0] sm:$0xff] }
  0x20   : > { %3187 = vmatprep.subr.mxu1 %v3675_v2  ;;  %3152 = vmatprep.subr.mxu0 %v3675_v2  ;;  %v2696_v7 = vld [vmem:[%s4792_s8] ss:$0 sm:$0xff] }
  0x21   : > { %3188 = vmatpush3.msra.mxu1 %v571_v21  ;;  %3153 = vmatpush3.msra.mxu0 %v478_v22  ;;  %v2730_v14 = vld [vmem:[%s4787_s3 + $0xe0] sm:$0xff]  ;;  %v2723_v21 = vld [vmem:[%s4787_s3 + $0xa8] sm:$0xff] }
  0x22   : > { %3189 = vmatprep.subr.mxu1 %v3675_v2  ;;  %3154 = vmatprep.subr.mxu0 %v3675_v2  ;;  %v2726_v18 = vld [vmem:[%s4787_s3 + $0xc0] sm:$0xff] }
  0x23   : > { %3190 = vmatpush3.msra.mxu1 %v570_v23  ;;  %3155 = vmatpush3.msra.mxu0 %v477_v24  ;;  %v2722_v22 = vld [vmem:[%s4787_s3 + $0xa0] sm:$0xff]  ;;  %v2721_v23 = vld [vmem:[%s4787_s3 + $0x98] sm:$0xff]  ;;  %v2720_v24 = vld [vmem:[%s4787_s3 + $0x90] sm:$0xff] }
  0x24   : > { %3191 = vmatprep.subr.mxu1 %v3675_v2  ;;  %3156 = vmatprep.subr.mxu0 %v3675_v2 }
  0x25   : > { %3192 = vmatpush3.msra.mxu1 %v569_v25  ;;  %3157 = vmatpush3.msra.mxu0 %v476_v26  ;;  %v2719_v25 = vld [vmem:[%s4787_s3 + $0x88] sm:$0xff]  ;;  %v2718_v26 = vld [vmem:[%s4787_s3 + $0x80] sm:$0xff] }
  0x26   : > { %3193 = vmatprep.subr.mxu1 %v3675_v2  ;;  %3158 = vmatprep.subr.mxu0 %v3675_v2 }
  0x27   : > { %3194 = vmatpush3.msra.mxu1 %v568_v27  ;;  %3159 = vmatpush3.msra.mxu0 %v475_v28 }
  0x28   : > { %3195 = vmatprep.subr.mxu1 %v3675_v2  ;;  %3160 = vmatprep.subr.mxu0 %v3675_v2 }
  0x29   : > { %3196 = vmatpush3.msra.mxu1 %v567_v29  ;;  %3161 = vmatpush3.msra.mxu0 %v474_v30  ;;  %v2715_v30 = vld [vmem:[%s4786_s2 + $0xf8] sm:$0xff] }
  0x2a   : > { %3197 = vmatprep.subr.mxu1 %v3675_v2  ;;  %3199 = vmatprep.mubr.msk.f32.mxu1 %vm3676_vm0, %v3675_v2 }
  0x2b   : > { %3198 = vmatpush3.msra.mxu1 %v566_v31  ;;  %3162 = vmatprep.subr.mxu0 %v3675_v2  ;;  %v2714_v31 = vld [vmem:[%s4786_s2 + $0xf0] sm:$0xff] }
  0x2c   : > { %3200 = vmatmul.mubr.f32.vlgmr.msra.gmra.mxu1 %v3897_v32  ;;  %3163 = vmatpush3.msra.mxu0 %v473_v33  ;;  %v2713_v33 = vld [vmem:[%s4786_s2 + $0xe8] sm:$0xff] }
  0x2d   : > { %3164 = vmatprep.mubr.msk.f32.mxu0 %vm3676_vm0, %v3675_v2  ;;  %3237 = vmatprep.subr.mxu1 %v3675_v2 }
  0x2e   : > { %3165 = vmatmul.mubr.f32.vlgmr.msra.gmra.mxu0 %v3907_v34  ;;  %3239 = vmatprep.mubr.msk.f32.mxu1 %vm3676_vm0, %v3675_v2 }
  0x2f   : > { %3202 = vmatprep.subr.mxu0 %v3675_v2  ;;  %3234 = vmatprep.mubr.msk.f32.mxu0 %vm3676_vm0, %v3675_v2 }
  0x30   : > { %3203 = vmatpush3.msra.mxu0 %v674_v43  ;;  %v2704_v43 = vld [vmem:[%s4786_s2 + $0xa0] sm:$0xff] }
  0x31   : > { %3204 = vmatprep.subr.mxu0 %v3675_v2 }
  0x32   : > { %3205 = vmatpush3.msra.mxu0 %v673_v44  ;;  %v2703_v44 = vld [vmem:[%s4786_s2 + $0x98] sm:$0xff] }
  0x33   : > { %3206 = vmatprep.subr.mxu0 %v3675_v2 }
  0x34   : > { %3207 = vmatpush3.msra.mxu0 %v672_v45  ;;  %v2702_v45 = vld [vmem:[%s4786_s2 + $0x90] sm:$0xff] }
  0x35   : > { %3208 = vmatprep.subr.mxu0 %v3675_v2 }
  0x36   : > { %3209 = vmatpush3.msra.mxu0 %v671_v46  ;;  %v2701_v46 = vld [vmem:[%s4786_s2 + $0x88] sm:$0xff] }
  0x37   : > { %3210 = vmatprep.subr.mxu0 %v3675_v2 }
  0x38   : > { %3211 = vmatpush3.msra.mxu0 %v670_v47  ;;  %v2700_v47 = vld [vmem:[%s4786_s2 + $0x80] sm:$0xff] }
  0x39   : > { %3212 = vmatprep.subr.mxu0 %v3675_v2 }
  0x3a   : > { %3213 = vmatpush3.msra.mxu0 %v669_v48  ;;  %v2751_v48 = vld [vmem:[%s4788_s4 + $0xf8] sm:$0xff] }
  0x3b   : > { %3214 = vmatprep.subr.mxu0 %v3675_v2 }
  0x3c   : > { %3215 = vmatpush3.msra.mxu0 %v668_v49  ;;  %v2750_v49 = vld [vmem:[%s4788_s4 + $0xf0] sm:$0xff] }
  0x3d   : > { %3216 = vmatprep.subr.mxu0 %v3675_v2 }
  0x3e   : > { %3217 = vmatpush3.msra.mxu0 %v667_v50  ;;  %v2749_v50 = vld [vmem:[%s4788_s4 + $0xe8] sm:$0xff] }
  0x3f   : > { %3218 = vmatprep.subr.mxu0 %v3675_v2 }
  0x40   : > { %3219 = vmatpush3.msra.mxu0 %v666_v51  ;;  %v2748_v51 = vld [vmem:[%s4788_s4 + $0xe0] sm:$0xff] }
  0x41   : > { %3220 = vmatprep.subr.mxu0 %v3675_v2 }
  0x42   : > { %3221 = vmatpush3.msra.mxu0 %v665_v52  ;;  %v2747_v52 = vld [vmem:[%s4788_s4 + $0xd8] sm:$0xff] }
  0x43   : > { %3222 = vmatprep.subr.mxu0 %v3675_v2 }
  0x44   : > { %3223 = vmatpush3.msra.mxu0 %v664_v53  ;;  %v2746_v53 = vld [vmem:[%s4788_s4 + $0xd0] sm:$0xff] }
  0x45   : > { %3224 = vmatprep.subr.mxu0 %v3675_v2 }
  0x46   : > { %3225 = vmatpush3.msra.mxu0 %v663_v54  ;;  %v2745_v54 = vld [vmem:[%s4788_s4 + $0xc8] sm:$0xff] }
  0x47   : > { %3226 = vmatprep.subr.mxu0 %v3675_v2 }
  0x48   : > { %3227 = vmatpush3.msra.mxu0 %v662_v55  ;;  %v2744_v55 = vld [vmem:[%s4788_s4 + $0xc0] sm:$0xff] }
  0x49   : > { %3228 = vmatprep.subr.mxu0 %v3675_v2 }
  0x4a   : > { %3229 = vmatpush3.msra.mxu0 %v661_v56  ;;  %v2743_v56 = vld [vmem:[%s4788_s4 + $0xb8] sm:$0xff] }
  0x4b   : > { %3230 = vmatprep.subr.mxu0 %v3675_v2 }
  0x4c   : > { %3231 = vmatpush3.msra.mxu0 %v660_v57  ;;  %v2742_v57 = vld [vmem:[%s4788_s4 + $0xb0] sm:$0xff] }
  0x4d   : > { %3232 = vmatprep.subr.mxu0 %v3675_v2 }
  0x4e   : > { %3233 = vmatpush3.msra.mxu0 %v659_v58  ;;  %v2741_v58 = vld [vmem:[%s4788_s4 + $0xa8] sm:$0xff] }
  0x4f   : > { %3235 = vmatmul.mubr.f32.vlgmr.msra.gmra.mxu0 %v3897_v32  ;;  %3282 = vmatprep.subr.mxu0 %v3675_v2 }
  0x50   : > { %3314 = vmatprep.mubr.msk.f32.mxu0 %vm3676_vm0, %v3675_v2  ;;  %3283 = vmatpush3.msra.mxu0 %v2733_v9 }
  0x51   : > { %3284 = vmatprep.subr.mxu0 %v3675_v2 }
  0x52   : > { %3285 = vmatpush3.msra.mxu0 %v2732_v10 }
  0x53   : > { %3286 = vmatprep.subr.mxu0 %v3675_v2 }
  0x54   : > { %3287 = vmatpush3.msra.mxu0 %v2731_v13 }
  0x55   : > { %3288 = vmatprep.subr.mxu0 %v3675_v2 }
  0x56   : > { %3289 = vmatpush3.msra.mxu0 %v2730_v14 }
  0x57   : > { %3290 = vmatprep.subr.mxu0 %v3675_v2 }
  0x58   : > { %3291 = vmatpush3.msra.mxu0 %v2729_v15 }
  0x59   : > { %3292 = vmatprep.subr.mxu0 %v3675_v2 }
  0x5a   : > { %3293 = vmatpush3.msra.mxu0 %v2728_v16  ;;  %v2753_v16 = vld [vmem:[%s4792_s8 + $0x1] ss:$0 sm:$0xff] }
  0x5b   : > { %3294 = vmatprep.subr.mxu0 %v3675_v2 }
  0x5c   : > { %3295 = vmatpush3.msra.mxu0 %v2727_v17 }
  0x5d   : > { %3296 = vmatprep.subr.mxu0 %v3675_v2 }
  0x5e   : > { %3297 = vmatpush3.msra.mxu0 %v2726_v18 }
  0x5f   : > { %3298 = vmatprep.subr.mxu0 %v3675_v2 }
  0x60   : > { %3299 = vmatpush3.msra.mxu0 %v2725_v19 }
  0x61   : > { %3300 = vmatprep.subr.mxu0 %v3675_v2 }
  0x62   : > { %3301 = vmatpush3.msra.mxu0 %v2724_v20 }
  0x63   : > { %3302 = vmatprep.subr.mxu0 %v3675_v2 }
  0x64   : > { %3303 = vmatpush3.msra.mxu0 %v2723_v21 }
  0x65   : > { %3304 = vmatprep.subr.mxu0 %v3675_v2 }
  0x66   : > { %3305 = vmatpush3.msra.mxu0 %v2722_v22 }
  0x67   : > { %3306 = vmatprep.subr.mxu0 %v3675_v2 }
  0x68   : > { %3307 = vmatpush3.msra.mxu0 %v2721_v23 }
  0x69   : > { %3308 = vmatprep.subr.mxu0 %v3675_v2 }
  0x6a   : > { %3309 = vmatpush3.msra.mxu0 %v2720_v24 }
  0x6b   : > { %3310 = vmatprep.subr.mxu0 %v3675_v2 }
  0x6c   : > { %3311 = vmatpush3.msra.mxu0 %v2719_v25 }
  0x6d   : > { %3312 = vmatprep.subr.mxu0 %v3675_v2 }
  0x6e   : > { %3313 = vmatpush3.msra.mxu0 %v2718_v26 }
  0x6f   : > { %3315 = vmatmul.mubr.f32.vlgmr.msra.gmra.mxu0 %v3897_v32  ;;  %3352 = vmatprep.subr.mxu0 %v3675_v2 }
  0x70   : > { %3354 = vmatprep.mubr.msk.f32.mxu0 %vm3676_vm0, %v3675_v2 }
  0xec   : > { %v655_v36 = vpop.f32.mrf.mxu1 }
  0xed   : > { %v656_v38 = vadd.f32 %v2695_v35, %v655_v36  ;;  %v2712_v35 = vld [vmem:[%s4786_s2 + $0xe0] sm:$0xff]  ;;  %v2711_v36 = vld [vmem:[%s4786_s2 + $0xd8] sm:$0xff] }
  0xee   : > { %v562_v39 = vpop.f32.mrf.mxu0  ;;  %v3201_v40 = vpop.f32.mrf.mxu1 }
  0xef   : > { %v563_v41 = vadd.f32 %v2694_v37, %v562_v39  ;;  %3238 = vmatpush3.xpose.msk.msra.mxu1 %vm752_vm1, %v656_v38  ;;  %v2710_v37 = vld [vmem:[%s4786_s2 + $0xd0] sm:$0xff]  ;;  %v2709_v38 = vld [vmem:[%s4786_s2 + $0xc8] sm:$0xff]  ;;  %v2708_v39 = vld [vmem:[%s4786_s2 + $0xc0] sm:$0xff] }
  0xf0   : > { %v3166_v42 = vpop.f32.mrf.mxu0  ;;  %3242 = vmatprep.subr.mxu1 %v3675_v2  ;;  %v2707_v40 = vld [vmem:[%s4786_s2 + $0xb8] sm:$0xff] }
  0xf1   : > { %v2705_v42 = vld [vmem:[%s4786_s2 + $0xa8] sm:$0xff] }
  0xf2   : > { %3240 = vmatmul.mubr.msk.f32.vlgmr.msra.gmra.mxu1 %vm752_vm1, %v563_v41  ;;  %v2706_v41 = vld [vmem:[%s4786_s2 + $0xb0] sm:$0xff] }
  0xf3   : > { %3244 = vmatprep.mubr.msk.f32.mxu1 %vm3676_vm0, %v3675_v2 }
 0x10f   : > { %v748_v8 = vpop.f32.mrf.mxu0 }
 0x110   : > { %v749_v11 = vadd.f32 %v2696_v7, %v748_v8 }
 0x111   : > { %v3236_v12 = vpop.f32.mrf.mxu0 }
 0x112   : > { %3243 = vmatpush3.msra.mxu1 %v749_v11  ;;  %v2717_v12 = vld [vmem:[%s4790_s6 + $0x1] ss:$0 sm:$0xff] }
 0x113   : > { %3247 = vmatprep.subr.mxu1 %v3675_v2 }
 0x12f   : > { %v1106_v7 = vpop.f32.mrf.mxu0 }
 0x131   : > { %v3316_v9 = vpop.f32.mrf.mxu0 }
 0x132   : > { %v2766_v9 = vld [vmem:[%s4786_s2 + $0x118] sm:$0xff] }
 0x1b2   : > { %v825_v59 = vpop.f32.mrf.mxu1 }
 0x1b3   : > { %v829_v61 = vmul.f32 0.17677669, %v825_v59  ;;  %v2740_v59 = vld [vmem:[%s4788_s4 + $0xa0] sm:$0xff] }
 0x1b4   : > { %v3241_v62 = vpop.f32.mrf.mxu1 }
 0x1b5   : > { %v830_v63 = vadd.f32 %v829_v61, %v4004_v60  ;;  %v2739_v61 = vld [vmem:[%s4788_s4 + $0x98] sm:$0xff]  ;;  %v2738_v62 = vld [vmem:[%s4788_s4 + $0x90] sm:$0xff] }
 0x1b7   : > { %v832_v0 = vsel %vm831_vm2, %v830_v63, -inf }
 0x1b8   : > { %833 = vmax.xlane.f32.xlu0 %v832_v0  ;;  %v2736_v0 = vld [vmem:[%s4788_s4 + $0x80] sm:$0xff] }
 0x241   : > { %v834_v1 = vpop.xlane.xlu0 %833 }
 0x242   : > { %v835_v3 = vsub.f32 %v830_v63, %v834_v1  ;;  %v2737_v63 = vld [vmem:[%s4788_s4 + $0x88] sm:$0xff]  ;;  %v919_v1 = vld [vmem:[%s4789_s5 + $0x18] sm:$0xff] }
 0x244   : > { %v836_v4 = vmul.f32 1.442695, %v835_v3  ;;  %v918_v3 = vld [vmem:[%s4789_s5 + $0x10] sm:$0xff] }
 0x246   : > { %3646 = vpow2.f32 %v836_v4  ;;  %v917_v4 = vld [vmem:[%s4789_s5 + $0x8] sm:$0xff] }
 0x253   : > { %v3647_v5 = vpop.eup %3646 }
 0x254   : > { %v838_v6 = vsel %vm831_vm2, %v3647_v5, 0.0 }
 0x255   : > { %839 = vadd.xlane.f32.xlu0 %v838_v6  ;;  %v2735_v6 = vld [vmem:[%s4791_s7 + $0x1] ss:$0 sm:$0xff] }
 0x256   : > { %v1107_v8 = vadd.f32 %v2735_v6, %v1106_v7  ;;  %v2769_v6 = vld [vmem:[%s4786_s2 + $0x130] sm:$0xff]  ;;  %v2768_v7 = vld [vmem:[%s4786_s2 + $0x128] sm:$0xff] }
 0x258   : > { %3353 = vmatpush3.xpose.msk.msra.mxu0 %vm752_vm1, %v1107_v8  ;;  %v2767_v8 = vld [vmem:[%s4786_s2 + $0x120] sm:$0xff] }
 0x259   : > { %3357 = vmatprep.subr.mxu0 %v3675_v2 }
 0x2de   : > { %v840_v27 = vpop.xlane.xlu0 %839 }
 0x2df   : > { %3648 = vrcp.f32 %v840_v27 }
 0x2ec   : > { %v3649_v28 = vpop.eup %3648 }
 0x2ed   : > { %v842_v29 = vmul.f32 %v3649_v28, %v3647_v5  ;;  %v916_v5 = vld [vmem:[%s4789_s5] sm:$0xff] }
 0x2ef   : > { %3245 = vmatmul.mubr.msk.f32.vlgmr.msra.gmra.mxu1 %vm831_vm2, %v842_v29 }
 0x2f0   : > { %3248 = vmatpush3.msra.mxu1 %v2715_v30  ;;  %3279 = vmatprep.mubr.msk.f32.mxu1 %vm3676_vm0, %v3675_v2 }
 0x2f1   : > { %3249 = vmatprep.subr.mxu1 %v3675_v2 }
 0x2f2   : > { %3250 = vmatpush3.msra.mxu1 %v2714_v31 }
 0x2f3   : > { %3251 = vmatprep.subr.mxu1 %v3675_v2 }
 0x2f4   : > { %3252 = vmatpush3.msra.mxu1 %v2713_v33  ;;  %v2796_v33 = vld [vmem:[%s4787_s3 + $0x178] sm:$0xff] }
 0x2f5   : > { %3253 = vmatprep.subr.mxu1 %v3675_v2 }
 0x2f6   : > { %3254 = vmatpush3.msra.mxu1 %v2712_v35  ;;  %v2795_v35 = vld [vmem:[%s4787_s3 + $0x170] sm:$0xff] }
 0x2f7   : > { %3255 = vmatprep.subr.mxu1 %v3675_v2 }
 0x2f8   : > { %3256 = vmatpush3.msra.mxu1 %v2711_v36 }
 0x2f9   : > { %3257 = vmatprep.subr.mxu1 %v3675_v2 }
 0x2fa   : > { %3258 = vmatpush3.msra.mxu1 %v2710_v37 }
 0x2fb   : > { %3259 = vmatprep.subr.mxu1 %v3675_v2 }
 0x2fc   : > { %3260 = vmatpush3.msra.mxu1 %v2709_v38 }
 0x2fd   : > { %3261 = vmatprep.subr.mxu1 %v3675_v2 }
 0x2fe   : > { %3262 = vmatpush3.msra.mxu1 %v2708_v39  ;;  %v2760_v39 = vld [vmem:[%s4789_s5 + $0x38] sm:$0xff] }
 0x2ff   : > { %3263 = vmatprep.subr.mxu1 %v3675_v2 }
 0x300   : > { %3264 = vmatpush3.msra.mxu1 %v2707_v40  ;;  %v2759_v40 = vld [vmem:[%s4789_s5 + $0x30] sm:$0xff] }
 0x301   : > { %3265 = vmatprep.subr.mxu1 %v3675_v2 }
 0x302   : > { %3266 = vmatpush3.msra.mxu1 %v2706_v41  ;;  %v2758_v41 = vld [vmem:[%s4789_s5 + $0x28] sm:$0xff] }
 0x303   : > { %3267 = vmatprep.subr.mxu1 %v3675_v2 }
 0x304   : > { %3268 = vmatpush3.msra.mxu1 %v2705_v42  ;;  %v2757_v42 = vld [vmem:[%s4789_s5 + $0x20] sm:$0xff] }
 0x305   : > { %3269 = vmatprep.subr.mxu1 %v3675_v2 }
 0x306   : > { %3270 = vmatpush3.msra.mxu1 %v2704_v43  ;;  %v2794_v43 = vld [vmem:[%s4787_s3 + $0x168] sm:$0xff] }
 0x307   : > { %3271 = vmatprep.subr.mxu1 %v3675_v2 }
 0x308   : > { %3272 = vmatpush3.msra.mxu1 %v2703_v44  ;;  %v2793_v44 = vld [vmem:[%s4787_s3 + $0x160] sm:$0xff] }
 0x309   : > { %3273 = vmatprep.subr.mxu1 %v3675_v2 }
 0x30a   : > { %3274 = vmatpush3.msra.mxu1 %v2702_v45  ;;  %v2792_v45 = vld [vmem:[%s4787_s3 + $0x158] sm:$0xff] }
 0x30b   : > { %3275 = vmatprep.subr.mxu1 %v3675_v2 }
 0x30c   : > { %3276 = vmatpush3.msra.mxu1 %v2701_v46  ;;  %v2791_v46 = vld [vmem:[%s4787_s3 + $0x150] sm:$0xff] }
 0x30d   : > { %3277 = vmatprep.subr.mxu1 %v3675_v2 }
 0x30e   : > { %3278 = vmatpush3.msra.mxu1 %v2700_v47  ;;  %v2790_v47 = vld [vmem:[%s4787_s3 + $0x148] sm:$0xff] }
 0x30f   : > { %3280 = vmatmul.mubr.f32.vlgmr.msra.gmra.mxu1 %v3907_v34  ;;  %3317 = vmatprep.subr.mxu1 %v3675_v2 }
 0x310   : > { %3318 = vmatpush3.msra.mxu1 %v2751_v48  ;;  %3349 = vmatprep.mubr.msk.f32.mxu1 %vm3676_vm0, %v3675_v2  ;;  %v2789_v48 = vld [vmem:[%s4787_s3 + $0x140] sm:$0xff] }
 0x311   : > { %3319 = vmatprep.subr.mxu1 %v3675_v2 }
 0x312   : > { %3320 = vmatpush3.msra.mxu1 %v2750_v49  ;;  %v2788_v49 = vld [vmem:[%s4787_s3 + $0x138] sm:$0xff] }
 0x313   : > { %3321 = vmatprep.subr.mxu1 %v3675_v2 }
 0x314   : > { %3322 = vmatpush3.msra.mxu1 %v2749_v50  ;;  %v2787_v50 = vld [vmem:[%s4787_s3 + $0x130] sm:$0xff] }
 0x315   : > { %3323 = vmatprep.subr.mxu1 %v3675_v2 }
 0x316   : > { %3324 = vmatpush3.msra.mxu1 %v2748_v51  ;;  %v2786_v51 = vld [vmem:[%s4787_s3 + $0x128] sm:$0xff] }
 0x317   : > { %3325 = vmatprep.subr.mxu1 %v3675_v2 }
 0x318   : > { %3326 = vmatpush3.msra.mxu1 %v2747_v52  ;;  %v2785_v52 = vld [vmem:[%s4787_s3 + $0x120] sm:$0xff] }
 0x319   : > { %3327 = vmatprep.subr.mxu1 %v3675_v2 }
 0x31a   : > { %3328 = vmatpush3.msra.mxu1 %v2746_v53  ;;  %v2784_v53 = vld [vmem:[%s4787_s3 + $0x118] sm:$0xff] }
 0x31b   : > { %3329 = vmatprep.subr.mxu1 %v3675_v2 }
 0x31c   : > { %3330 = vmatpush3.msra.mxu1 %v2745_v54  ;;  %v2783_v54 = vld [vmem:[%s4787_s3 + $0x110] sm:$0xff] }
 0x31d   : > { %3331 = vmatprep.subr.mxu1 %v3675_v2 }
 0x31e   : > { %3332 = vmatpush3.msra.mxu1 %v2744_v55  ;;  %v2782_v55 = vld [vmem:[%s4787_s3 + $0x108] sm:$0xff] }
 0x31f   : > { %3333 = vmatprep.subr.mxu1 %v3675_v2 }
 0x320   : > { %3334 = vmatpush3.msra.mxu1 %v2743_v56  ;;  %v2781_v56 = vld [vmem:[%s4787_s3 + $0x100] sm:$0xff] }
 0x321   : > { %3335 = vmatprep.subr.mxu1 %v3675_v2 }
 0x322   : > { %3336 = vmatpush3.msra.mxu1 %v2742_v57  ;;  %v2778_v57 = vld [vmem:[%s4786_s2 + $0x178] sm:$0xff] }
 0x323   : > { %3337 = vmatprep.subr.mxu1 %v3675_v2 }
 0x324   : > { %3338 = vmatpush3.msra.mxu1 %v2741_v58 }
 0x325   : > { %3339 = vmatprep.subr.mxu1 %v3675_v2 }
 0x326   : > { %3340 = vmatpush3.msra.mxu1 %v2740_v59  ;;  %v2777_v59 = vld [vmem:[%s4786_s2 + $0x170] sm:$0xff] }
 0x327   : > { %3341 = vmatprep.subr.mxu1 %v3675_v2 }
 0x328   : > { %3342 = vmatpush3.msra.mxu1 %v2739_v61 }
 0x329   : > { %3343 = vmatprep.subr.mxu1 %v3675_v2 }
 0x32a   : > { %3344 = vmatpush3.msra.mxu1 %v2738_v62  ;;  %v2776_v62 = vld [vmem:[%s4786_s2 + $0x168] sm:$0xff] }
 0x32b   : > { %3345 = vmatprep.subr.mxu1 %v3675_v2 }
 0x32c   : > { %3346 = vmatpush3.msra.mxu1 %v2737_v63  ;;  %v2775_v63 = vld [vmem:[%s4786_s2 + $0x160] sm:$0xff] }
 0x32d   : > { %3347 = vmatprep.subr.mxu1 %v3675_v2 }
 0x32e   : > { %3348 = vmatpush3.msra.mxu1 %v2736_v0  ;;  %v2774_v0 = vld [vmem:[%s4786_s2 + $0x158] sm:$0xff] }
 0x32f   : > { %3373 = vmatprep.subr.mxu1 %v3675_v2  ;;  %3350 = vmatmul.mubr.f32.vlgmr.msra.gmra.mxu1 %v3897_v32 }
 0x330   : > { %3374 = vmatpush3.msra.mxu1 %v919_v1  ;;  %3381 = vmatprep.mubr.msk.f32.mxu1 %vm3676_vm0, %v3675_v2  ;;  %v2773_v1 = vld [vmem:[%s4786_s2 + $0x150] sm:$0xff] }
 0x331   : > { %3375 = vmatprep.subr.mxu1 %v3675_v2 }
 0x332   : > { %3376 = vmatpush3.msra.mxu1 %v918_v3  ;;  %v2772_v3 = vld [vmem:[%s4786_s2 + $0x148] sm:$0xff] }
 0x333   : > { %3377 = vmatprep.subr.mxu1 %v3675_v2 }
 0x334   : > { %3378 = vmatpush3.msra.mxu1 %v917_v4  ;;  %v2771_v4 = vld [vmem:[%s4786_s2 + $0x140] sm:$0xff] }
 0x335   : > { %3379 = vmatprep.subr.mxu1 %v3675_v2 }
 0x336   : > { %3380 = vmatpush3.msra.mxu1 %v916_v5  ;;  %v2770_v5 = vld [vmem:[%s4786_s2 + $0x138] sm:$0xff] }
 0x337   : > { %3419 = vmatprep.subr.mxu1 %v3675_v2 }
 0x3af   : > { %v912_v10 = vpop.f32.mrf.mxu1 }
 0x3b0   : > { %3382 = vmatmul.mubr.msk.f32.vlgmr.msra.gmra.mxu1 %vm752_vm1, %v912_v10  ;;  %v2765_v10 = vld [vmem:[%s4786_s2 + $0x110] sm:$0xff] }
 0x3b1   : > { %v3246_v11 = vpop.f32.mrf.mxu1  ;;  %3451 = vmatprep.mubr.msk.f32.mxu1 %vm3676_vm0, %v3675_v2  ;;  %3420 = vmatpush3.msra.mxu1 %v2796_v33  ;;  %v2805_v33 = vld [vmem:[%s4788_s4 + $0x130] sm:$0xff] }
 0x3b2   : > { %3421 = vmatprep.subr.mxu1 %v3675_v2  ;;  %v2764_v11 = vld [vmem:[%s4786_s2 + $0x108] sm:$0xff] }
 0x3b3   : > { %3422 = vmatpush3.msra.mxu1 %v2795_v35  ;;  %v2804_v35 = vld [vmem:[%s4788_s4 + $0x128] sm:$0xff] }
 0x3b4   : > { %3423 = vmatprep.subr.mxu1 %v3675_v2 }
 0x3b5   : > { %3424 = vmatpush3.msra.mxu1 %v2794_v43 }
 0x3b6   : > { %3425 = vmatprep.subr.mxu1 %v3675_v2 }
 0x3b7   : > { %3426 = vmatpush3.msra.mxu1 %v2793_v44 }
 0x3b8   : > { %3427 = vmatprep.subr.mxu1 %v3675_v2 }
 0x3b9   : > { %3428 = vmatpush3.msra.mxu1 %v2792_v45 }
 0x3ba   : > { %3429 = vmatprep.subr.mxu1 %v3675_v2 }
 0x3bb   : > { %3430 = vmatpush3.msra.mxu1 %v2791_v46 }
 0x3bc   : > { %3431 = vmatprep.subr.mxu1 %v3675_v2 }
 0x3bd   : > { %3432 = vmatpush3.msra.mxu1 %v2790_v47 }
 0x3be   : > { %3433 = vmatprep.subr.mxu1 %v3675_v2 }
 0x3bf   : > { %3434 = vmatpush3.msra.mxu1 %v2789_v48 }
 0x3c0   : > { %3435 = vmatprep.subr.mxu1 %v3675_v2 }
 0x3c1   : > { %3436 = vmatpush3.msra.mxu1 %v2788_v49 }
 0x3c2   : > { %3437 = vmatprep.subr.mxu1 %v3675_v2 }
 0x3c3   : > { %3438 = vmatpush3.msra.mxu1 %v2787_v50  ;;  %v2816_v50 = vld [vmem:[%s4792_s8 + $0x2] ss:$0 sm:$0xff] }
 0x3c4   : > { %3439 = vmatprep.subr.mxu1 %v3675_v2 }
 0x3c5   : > { %3440 = vmatpush3.msra.mxu1 %v2786_v51 }
 0x3c6   : > { %3441 = vmatprep.subr.mxu1 %v3675_v2 }
 0x3c7   : > { %3442 = vmatpush3.msra.mxu1 %v2785_v52 }
 0x3c8   : > { %3443 = vmatprep.subr.mxu1 %v3675_v2 }
 0x3c9   : > { %3444 = vmatpush3.msra.mxu1 %v2784_v53 }
 0x3ca   : > { %3445 = vmatprep.subr.mxu1 %v3675_v2 }
 0x3cb   : > { %3446 = vmatpush3.msra.mxu1 %v2783_v54  ;;  %v2857_v54 = vld [vmem:[%s4787_s3 + $0x1f0] sm:$0xff] }
 0x3cc   : > { %3447 = vmatprep.subr.mxu1 %v3675_v2 }
 0x3cd   : > { %3448 = vmatpush3.msra.mxu1 %v2782_v55 }
 0x3ce   : > { %3449 = vmatprep.subr.mxu1 %v3675_v2 }
 0x3cf   : > { %v1011_v13 = vpop.f32.mrf.mxu1  ;;  %3450 = vmatpush3.msra.mxu1 %v2781_v56 }
 0x3d0   : > { %v1012_v14 = vadd.f32 %v2717_v12, %v1011_v13  ;;  %3452 = vmatmul.mubr.f32.vlgmr.msra.gmra.mxu1 %v3897_v32  ;;  %3489 = vmatprep.subr.mxu1 %v3675_v2  ;;  %v2763_v12 = vld [vmem:[%s4786_s2 + $0x100] sm:$0xff] }
 0x3d1   : > { %v3281_v15 = vpop.f32.mrf.mxu1  ;;  %3491 = vmatprep.mubr.msk.f32.mxu1 %vm3676_vm0, %v3675_v2  ;;  %v2798_v13 = vld [vmem:[%s4791_s7 + $0x2] ss:$0 sm:$0xff] }
 0x3d2   : > { %3355 = vmatmul.mubr.msk.f32.vlgmr.msra.gmra.mxu0 %vm752_vm1, %v1012_v14 }
 0x3d3   : > { %3359 = vmatprep.mubr.msk.f32.mxu0 %vm3676_vm0, %v3675_v2 }
 0x3ef   : > { %v1201_v17 = vpop.f32.mrf.mxu1 }
 0x3f0   : > { %v1202_v18 = vadd.f32 %v2753_v16, %v1201_v17 }
 0x3f1   : > { %v3351_v19 = vpop.f32.mrf.mxu1 }
 0x3f2   : > { %3358 = vmatpush3.msra.mxu0 %v1202_v18 }
 0x3f3   : > { %3362 = vmatprep.subr.mxu0 %v3675_v2 }
 0x470   : > { %v4251_v20 = vpop.f32.mrf.mxu1 }
 0x472   : > { %v3383_v21 = vpop.f32.mrf.mxu1 }
 0x490   : > { %v1704_v14 = vpop.f32.mrf.mxu1 }
 0x491   : > { %v1705_v15 = vadd.f32 %v2798_v13, %v1704_v14  ;;  %v2843_v13 = vld [vmem:[%s4787_s3 + $0x180] sm:$0xff] }
 0x492   : > { %v1277_v22 = vpop.f32.mrf.mxu0  ;;  %v3453_v16 = vpop.f32.mrf.mxu1  ;;  %v4582_v14 = vld [vmem:[%s3883_s29] sm:$0xff] }
 0x493   : > { %v1281_v23 = vmul.f32 0.17677669, %v1277_v22  ;;  %3490 = vmatpush3.xpose.msk.msra.mxu1 %vm752_vm1, %v1705_v15  ;;  %v2840_v15 = vld [vmem:[%s4786_s2 + $0x1f8] sm:$0xff] }
 0x494   : > { %v3356_v24 = vpop.f32.mrf.mxu0  ;;  %3494 = vmatprep.subr.mxu1 %v3675_v2 }
 0x495   : > { %v1282_v25 = vadd.f32 %v1281_v23, %v4004_v60  ;;  %v2814_v23 = vld [vmem:[%s4788_s4 + $0x178] sm:$0xff]  ;;  %v2813_v24 = vld [vmem:[%s4788_s4 + $0x170] sm:$0xff] }
 0x497   : > { %v1283_v26 = vsel %vm831_vm2, %v1282_v25, -inf }
 0x498   : > { %1284 = vmax.xlane.f32.xlu1 %v1283_v26  ;;  %v2811_v26 = vld [vmem:[%s4788_s4 + $0x160] sm:$0xff] }
 0x521   : > { %v1285_v27 = vpop.xlane.xlu1 %1284 }
 0x522   : > { %v1286_v28 = vsub.f32 %v1282_v25, %v1285_v27  ;;  %v2812_v25 = vld [vmem:[%s4788_s4 + $0x168] sm:$0xff]  ;;  %v2810_v27 = vld [vmem:[%s4788_s4 + $0x158] sm:$0xff] }
 0x524   : > { %v1287_v29 = vmul.f32 1.442695, %v1286_v28  ;;  %v2809_v28 = vld [vmem:[%s4788_s4 + $0x150] sm:$0xff] }
 0x526   : > { %3650 = vpow2.f32 %v1287_v29  ;;  %v2808_v29 = vld [vmem:[%s4788_s4 + $0x148] sm:$0xff] }
 0x533   : > { %v3651_v30 = vpop.eup %3650 }
 0x534   : > { %v1289_v31 = vsel %vm831_vm2, %v3651_v30, 0.0 }
 0x535   : > { %1290 = vadd.xlane.f32.xlu1 %v1289_v31  ;;  %v2806_v31 = vld [vmem:[%s4788_s4 + $0x138] sm:$0xff] }
 0x5be   : > { %v1291_v36 = vpop.xlane.xlu1 %1290 }
 0x5bf   : > { %3652 = vrcp.f32 %v1291_v36  ;;  %v2803_v36 = vld [vmem:[%s4788_s4 + $0x120] sm:$0xff] }
 0x5cc   : > { %v3653_v37 = vpop.eup %3652 }
 0x5cd   : > { %v1293_v38 = vmul.f32 %v3653_v37, %v3651_v30  ;;  %v2807_v30 = vld [vmem:[%s4788_s4 + $0x140] sm:$0xff]  ;;  %v2802_v37 = vld [vmem:[%s4788_s4 + $0x118] sm:$0xff] }
 0x5cf   : > { %3360 = vmatmul.mubr.msk.f32.vlgmr.msra.gmra.mxu0 %vm831_vm2, %v1293_v38  ;;  %v2801_v38 = vld [vmem:[%s4788_s4 + $0x110] sm:$0xff] }
 0x5d0   : > { %3363 = vmatpush3.msra.mxu0 %v2760_v39  ;;  %3370 = vmatprep.mubr.msk.f32.mxu0 %vm3676_vm0, %v3675_v2  ;;  %v2800_v39 = vld [vmem:[%s4788_s4 + $0x108] sm:$0xff] }
 0x5d1   : > { %3364 = vmatprep.subr.mxu0 %v3675_v2 }
 0x5d2   : > { %3365 = vmatpush3.msra.mxu0 %v2759_v40  ;;  %v2799_v40 = vld [vmem:[%s4788_s4 + $0x100] sm:$0xff] }
 0x5d3   : > { %3366 = vmatprep.subr.mxu0 %v3675_v2 }
 0x5d4   : > { %3367 = vmatpush3.msra.mxu0 %v2758_v41 }
 0x5d5   : > { %3368 = vmatprep.subr.mxu0 %v3675_v2 }
 0x5d6   : > { %3369 = vmatpush3.msra.mxu0 %v2757_v42 }
 0x5d7   : > { %3384 = vmatprep.subr.mxu0 %v3675_v2 }
 0x68f   : > { %v1363_v58 = vpop.f32.mrf.mxu0 }
 0x690   : > { %3371 = vmatmul.mubr.msk.f32.vlgmr.msra.gmra.mxu0 %vm752_vm1, %v1363_v58  ;;  %v2823_v58 = vld [vmem:[%s4789_s5 + $0x58] sm:$0xff] }
 0x691   : > { %3385 = vmatpush3.msra.mxu0 %v2778_v57  ;;  %v3361_v61 = vpop.f32.mrf.mxu0  ;;  %3416 = vmatprep.mubr.msk.f32.mxu0 %vm3676_vm0, %v3675_v2 }
 0x692   : > { %3386 = vmatprep.subr.mxu0 %v3675_v2  ;;  %v2821_v61 = vld [vmem:[%s4789_s5 + $0x48] sm:$0xff] }
 0x693   : > { %3387 = vmatpush3.msra.mxu0 %v2777_v59  ;;  %v2822_v59 = vld [vmem:[%s4789_s5 + $0x50] sm:$0xff] }
 0x694   : > { %3388 = vmatprep.subr.mxu0 %v3675_v2 }
 0x695   : > { %3389 = vmatpush3.msra.mxu0 %v2776_v62  ;;  %v2820_v62 = vld [vmem:[%s4789_s5 + $0x40] sm:$0xff] }
 0x696   : > { %3390 = vmatprep.subr.mxu0 %v3675_v2 }
 0x697   : > { %3391 = vmatpush3.msra.mxu0 %v2775_v63  ;;  %v2856_v63 = vld [vmem:[%s4787_s3 + $0x1e8] sm:$0xff] }
 0x698   : > { %3392 = vmatprep.subr.mxu0 %v3675_v2 }
 0x699   : > { %3393 = vmatpush3.msra.mxu0 %v2774_v0  ;;  %v2855_v0 = vld [vmem:[%s4787_s3 + $0x1e0] sm:$0xff] }
 0x69a   : > { %3394 = vmatprep.subr.mxu0 %v3675_v2 }
 0x69b   : > { %3395 = vmatpush3.msra.mxu0 %v2773_v1  ;;  %v2854_v1 = vld [vmem:[%s4787_s3 + $0x1d8] sm:$0xff] }
 0x69c   : > { %3396 = vmatprep.subr.mxu0 %v3675_v2 }
 0x69d   : > { %3397 = vmatpush3.msra.mxu0 %v2772_v3  ;;  %v2853_v3 = vld [vmem:[%s4787_s3 + $0x1d0] sm:$0xff] }
 0x69e   : > { %3398 = vmatprep.subr.mxu0 %v3675_v2 }
 0x69f   : > { %3399 = vmatpush3.msra.mxu0 %v2771_v4  ;;  %v2852_v4 = vld [vmem:[%s4787_s3 + $0x1c8] sm:$0xff] }
 0x6a0   : > { %3400 = vmatprep.subr.mxu0 %v3675_v2 }
 0x6a1   : > { %3401 = vmatpush3.msra.mxu0 %v2770_v5  ;;  %v2851_v5 = vld [vmem:[%s4787_s3 + $0x1c0] sm:$0xff] }
 0x6a2   : > { %3402 = vmatprep.subr.mxu0 %v3675_v2 }
 0x6a3   : > { %3403 = vmatpush3.msra.mxu0 %v2769_v6  ;;  %v2850_v6 = vld [vmem:[%s4787_s3 + $0x1b8] sm:$0xff] }
 0x6a4   : > { %3404 = vmatprep.subr.mxu0 %v3675_v2 }
 0x6a5   : > { %3405 = vmatpush3.msra.mxu0 %v2768_v7  ;;  %v2849_v7 = vld [vmem:[%s4787_s3 + $0x1b0] sm:$0xff] }
 0x6a6   : > { %3406 = vmatprep.subr.mxu0 %v3675_v2 }
 0x6a7   : > { %3407 = vmatpush3.msra.mxu0 %v2767_v8  ;;  %v2848_v8 = vld [vmem:[%s4787_s3 + $0x1a8] sm:$0xff] }
 0x6a8   : > { %3408 = vmatprep.subr.mxu0 %v3675_v2 }
 0x6a9   : > { %3409 = vmatpush3.msra.mxu0 %v2766_v9  ;;  %v2847_v9 = vld [vmem:[%s4787_s3 + $0x1a0] sm:$0xff] }
 0x6aa   : > { %3410 = vmatprep.subr.mxu0 %v3675_v2 }
 0x6ab   : > { %3411 = vmatpush3.msra.mxu0 %v2765_v10  ;;  %v2846_v10 = vld [vmem:[%s4787_s3 + $0x198] sm:$0xff] }
 0x6ac   : > { %3412 = vmatprep.subr.mxu0 %v3675_v2 }
 0x6ad   : > { %3413 = vmatpush3.msra.mxu0 %v2764_v11  ;;  %v2845_v11 = vld [vmem:[%s4787_s3 + $0x190] sm:$0xff] }
 0x6ae   : > { %3414 = vmatprep.subr.mxu0 %v3675_v2 }
 0x6af   : > { %3415 = vmatpush3.msra.mxu0 %v2763_v12  ;;  %v2844_v12 = vld [vmem:[%s4787_s3 + $0x188] sm:$0xff] }
 0x6b0   : > { %3417 = vmatmul.mubr.f32.vlgmr.msra.gmra.mxu0 %v3907_v34  ;;  %3454 = vmatprep.subr.mxu0 %v3675_v2  ;;  %v2780_v34 = vld [vmem:[%s4790_s6 + $0x2] ss:$0 sm:$0xff] }
 0x6b1   : > { %3486 = vmatprep.mubr.msk.f32.mxu0 %vm3676_vm0, %v3675_v2  ;;  %3455 = vmatpush3.msra.mxu0 %v2814_v23  ;;  %v2835_v23 = vld [vmem:[%s4786_s2 + $0x1d0] sm:$0xff] }
 0x6b2   : > { %3456 = vmatprep.subr.mxu0 %v3675_v2 }
 0x6b3   : > { %3457 = vmatpush3.msra.mxu0 %v2813_v24  ;;  %v2834_v24 = vld [vmem:[%s4786_s2 + $0x1c8] sm:$0xff] }
 0x6b4   : > { %3458 = vmatprep.subr.mxu0 %v3675_v2 }
 0x6b5   : > { %3459 = vmatpush3.msra.mxu0 %v2812_v25  ;;  %v2833_v25 = vld [vmem:[%s4786_s2 + $0x1c0] sm:$0xff] }
 0x6b6   : > { %3460 = vmatprep.subr.mxu0 %v3675_v2 }
 0x6b7   : > { %3461 = vmatpush3.msra.mxu0 %v2811_v26  ;;  %v2832_v26 = vld [vmem:[%s4786_s2 + $0x1b8] sm:$0xff] }
 0x6b8   : > { %3462 = vmatprep.subr.mxu0 %v3675_v2 }
 0x6b9   : > { %3463 = vmatpush3.msra.mxu0 %v2810_v27  ;;  %v2831_v27 = vld [vmem:[%s4786_s2 + $0x1b0] sm:$0xff] }
 0x6ba   : > { %3464 = vmatprep.subr.mxu0 %v3675_v2 }
 0x6bb   : > { %3465 = vmatpush3.msra.mxu0 %v2809_v28  ;;  %v2830_v28 = vld [vmem:[%s4786_s2 + $0x1a8] sm:$0xff] }
 0x6bc   : > { %3466 = vmatprep.subr.mxu0 %v3675_v2 }
 0x6bd   : > { %3467 = vmatpush3.msra.mxu0 %v2808_v29  ;;  %v2829_v29 = vld [vmem:[%s4786_s2 + $0x1a0] sm:$0xff] }
 0x6be   : > { %3468 = vmatprep.subr.mxu0 %v3675_v2 }
 0x6bf   : > { %3469 = vmatpush3.msra.mxu0 %v2807_v30  ;;  %v2828_v30 = vld [vmem:[%s4786_s2 + $0x198] sm:$0xff] }
 0x6c0   : > { %3470 = vmatprep.subr.mxu0 %v3675_v2 }
 0x6c1   : > { %3471 = vmatpush3.msra.mxu0 %v2806_v31  ;;  %v2827_v31 = vld [vmem:[%s4786_s2 + $0x190] sm:$0xff] }
 0x6c2   : > { %3472 = vmatprep.subr.mxu0 %v3675_v2 }
 0x6c3   : > { %3473 = vmatpush3.msra.mxu0 %v2805_v33  ;;  %v2826_v33 = vld [vmem:[%s4786_s2 + $0x188] sm:$0xff] }
 0x6c4   : > { %3474 = vmatprep.subr.mxu0 %v3675_v2 }
 0x6c5   : > { %3475 = vmatpush3.msra.mxu0 %v2804_v35  ;;  %v2825_v35 = vld [vmem:[%s4786_s2 + $0x180] sm:$0xff] }
 0x6c6   : > { %3476 = vmatprep.subr.mxu0 %v3675_v2 }
 0x6c7   : > { %3477 = vmatpush3.msra.mxu0 %v2803_v36  ;;  %v4655_v36 = vld [vmem:[%s3894_s18] sm:$0xff] }
 0x6c8   : > { %3478 = vmatprep.subr.mxu0 %v3675_v2 }
 0x6c9   : > { %3479 = vmatpush3.msra.mxu0 %v2802_v37  ;;  %v2860_v37 = vld [vmem:[%s4791_s7 + $0x3] ss:$0 sm:$0xff] }
 0x6ca   : > { %3480 = vmatprep.subr.mxu0 %v3675_v2 }
 0x6cb   : > { %3481 = vmatpush3.msra.mxu0 %v2801_v38 }
 0x6cc   : > { %3482 = vmatprep.subr.mxu0 %v3675_v2 }
 0x6cd   : > { %3483 = vmatpush3.msra.mxu0 %v2800_v39 }
 0x6ce   : > { %3484 = vmatprep.subr.mxu0 %v3675_v2 }
 0x6cf   : > { %3485 = vmatpush3.msra.mxu0 %v2799_v40 }
 0x6d0   : > { %3487 = vmatmul.mubr.f32.vlgmr.msra.gmra.mxu0 %v3897_v32  ;;  %3545 = vmatprep.subr.mxu0 %v3675_v2 }
 0x6d1   : > { %3577 = vmatprep.mubr.msk.f32.mxu0 %vm3676_vm0, %v3675_v2 }
 0x750   : > { %v4417_v17 = vpop.f32.mrf.mxu0 }
 0x752   : > { %v3372_v18 = vpop.f32.mrf.mxu0 }
 0x753   : > { %v2839_v18 = vld [vmem:[%s4786_s2 + $0x1f0] sm:$0xff] }
 0x770   : > { %v1609_v19 = vpop.f32.mrf.mxu0 }
 0x771   : > { %v1610_v21 = vadd.f32 %v2780_v34, %v1609_v19  ;;  %v2838_v19 = vld [vmem:[%s4786_s2 + $0x1e8] sm:$0xff] }
 0x772   : > { %v3418_v22 = vpop.f32.mrf.mxu0 }
 0x773   : > { %3492 = vmatmul.mubr.msk.f32.vlgmr.msra.gmra.mxu1 %vm752_vm1, %v1610_v21  ;;  %v2837_v21 = vld [vmem:[%s4786_s2 + $0x1e0] sm:$0xff]  ;;  %v2836_v22 = vld [vmem:[%s4786_s2 + $0x1d8] sm:$0xff] }
 0x774   : > { %3496 = vmatprep.mubr.msk.f32.mxu1 %vm3676_vm0, %v3675_v2 }
 0x790   : > { %v1799_v51 = vpop.f32.mrf.mxu0 }
 0x791   : > { %v1800_v52 = vadd.f32 %v2816_v50, %v1799_v51  ;;  %v2872_v50 = vld [vmem:[%s4788_s4 + $0x1d8] sm:$0xff]  ;;  %v2871_v51 = vld [vmem:[%s4788_s4 + $0x1d0] sm:$0xff] }
 0x792   : > { %v3488_v53 = vpop.f32.mrf.mxu0 }
 0x793   : > { %3495 = vmatpush3.msra.mxu1 %v1800_v52  ;;  %v2870_v52 = vld [vmem:[%s4788_s4 + $0x1c8] sm:$0xff]  ;;  %v2869_v53 = vld [vmem:[%s4788_s4 + $0x1c0] sm:$0xff] }
 0x794   : > { %3499 = vmatprep.subr.mxu1 %v3675_v2 }
 0x833   : > { %v1875_v41 = vpop.f32.mrf.mxu1 }
 0x834   : > { %v1879_v42 = vmul.f32 0.17677669, %v1875_v41  ;;  %v1515_v41 = vadd.f32 %v4251_v20, %v4417_v17  ;;  %v2876_v20 = vld [vmem:[%s4788_s4 + $0x1f8] sm:$0xff]  ;;  %v2875_v17 = vld [vmem:[%s4788_s4 + $0x1f0] sm:$0xff] }
 0x835   : > { %v3493_v43 = vpop.f32.mrf.mxu1 }
 0x836   : > { %v1880_v44 = vadd.f32 %v1879_v42, %v4004_v60  ;;  %v2858_v60 = vld [vmem:[%s4787_s3 + $0x1f8] sm:$0xff] }
 0x837   : > { %3546 = vmatpush3.msra.mxu0 %v2858_v60  ;;  %v2868_v60 = vld [vmem:[%s4788_s4 + $0x1b8] sm:$0xff] }
 0x838   : > { %v1881_v45 = vsel %vm831_vm2, %v1880_v44, -inf  ;;  %3547 = vmatprep.subr.mxu0 %v3675_v2 }
 0x839   : > { %1882 = vmax.xlane.f32.xlu0 %v1881_v45  ;;  %3548 = vmatpush3.msra.mxu0 %v2857_v54  ;;  %v2842_v45 = vld [vmem:[%s4790_s6 + $0x3] ss:$0 sm:$0xff]  ;;  %v2867_v54 = vld [vmem:[%s4788_s4 + $0x1b0] sm:$0xff] }
 0x83a   : > { %3549 = vmatprep.subr.mxu0 %v3675_v2 }
 0x83b   : > { %3550 = vmatpush3.msra.mxu0 %v2856_v63 }
 0x83c   : > { %3551 = vmatprep.subr.mxu0 %v3675_v2 }
 0x83d   : > { %3552 = vmatpush3.msra.mxu0 %v2855_v0 }
 0x83e   : > { %3553 = vmatprep.subr.mxu0 %v3675_v2 }
 0x83f   : > { %3554 = vmatpush3.msra.mxu0 %v2854_v1  ;;  %v3666_v1 = vld [vmem:[%s4001_s20] sm:$0xff] }
 0x840   : > { %3555 = vmatprep.subr.mxu0 %v3675_v2 }
 0x841   : > { %3556 = vmatpush3.msra.mxu0 %v2853_v3 }
 0x842   : > { %3557 = vmatprep.subr.mxu0 %v3675_v2 }
 0x843   : > { %3558 = vmatpush3.msra.mxu0 %v2852_v4 }
 0x844   : > { %3559 = vmatprep.subr.mxu0 %v3675_v2 }
 0x845   : > { %3560 = vmatpush3.msra.mxu0 %v2851_v5 }
 0x846   : > { %3561 = vmatprep.subr.mxu0 %v3675_v2 }
 0x847   : > { %3562 = vmatpush3.msra.mxu0 %v2850_v6 }
 0x848   : > { %3563 = vmatprep.subr.mxu0 %v3675_v2 }
 0x849   : > { %3564 = vmatpush3.msra.mxu0 %v2849_v7 }
 0x84a   : > { %3565 = vmatprep.subr.mxu0 %v3675_v2 }
 0x84b   : > { %3566 = vmatpush3.msra.mxu0 %v2848_v8 }
 0x84c   : > { %3567 = vmatprep.subr.mxu0 %v3675_v2 }
 0x84d   : > { %3568 = vmatpush3.msra.mxu0 %v2847_v9 }
 0x84e   : > { %3569 = vmatprep.subr.mxu0 %v3675_v2 }
 0x84f   : > { %3570 = vmatpush3.msra.mxu0 %v2846_v10  ;;  %v2878_v10 = vld [vmem:[%s4792_s8 + $0x3] ss:$0 sm:$0xff] }
 0x850   : > { %3571 = vmatprep.subr.mxu0 %v3675_v2 }
 0x851   : > { %3572 = vmatpush3.msra.mxu0 %v2845_v11 }
 0x852   : > { %3573 = vmatprep.subr.mxu0 %v3675_v2 }
 0x853   : > { %3574 = vmatpush3.msra.mxu0 %v2844_v12 }
 0x854   : > { %3575 = vmatprep.subr.mxu0 %v3675_v2 }
 0x855   : > { %3576 = vmatpush3.msra.mxu0 %v2843_v13 }
 0x856   : > { %3578 = vmatmul.mubr.f32.vlgmr.msra.gmra.mxu0 %v4582_v14  ;;  %3615 = vmatprep.subr.mxu0 %v3675_v2 }
 0x857   : > { %3617 = vmatprep.mubr.msk.f32.mxu0 %vm3676_vm0, %v3675_v2 }
 0x8c2   : > { %v1883_v46 = vpop.xlane.xlu0 %1882 }
 0x8c3   : > { %v1884_v47 = vsub.f32 %v1880_v44, %v1883_v46 }
 0x8c5   : > { %v1885_v48 = vmul.f32 1.442695, %v1884_v47 }
 0x8c7   : > { %3654 = vpow2.f32 %v1885_v48 }
 0x8d4   : > { %v3655_v49 = vpop.eup %3654 }
 0x8d5   : > { %v1887_v32 = vsel %vm831_vm2, %v3655_v49, 0.0 }
 0x8d6   : > { %1888 = vadd.xlane.f32.xlu1 %v1887_v32  ;;  %v2873_v32 = vld [vmem:[%s4788_s4 + $0x1e0] sm:$0xff] }
 0x916   : > { %v2230_v38 = vpop.f32.mrf.mxu0 }
 0x917   : > { %v2231_v39 = vadd.f32 %v2860_v37, %v2230_v38 }
 0x918   : > { %v3579_v40 = vpop.f32.mrf.mxu0 }
 0x919   : > { %3616 = vmatpush3.xpose.msk.msra.mxu0 %vm752_vm1, %v2231_v39  ;;  %v2888_v40 = vld [vmem:[%s4795_s11] ss:$0 sm:$0xff] }
 0x91a   : > { %3620 = vmatprep.subr.mxu0 %v3675_v2 }
 0x95f   : > { %v1889_v55 = vpop.xlane.xlu1 %1888 }
 0x960   : > { %3656 = vrcp.f32 %v1889_v55  ;;  %v2866_v55 = vld [vmem:[%s4788_s4 + $0x1a8] sm:$0xff] }
 0x96d   : > { %v3657_v56 = vpop.eup %3656 }
 0x96e   : > { %v1891_v57 = vmul.f32 %v3657_v56, %v3655_v49  ;;  %v2874_v49 = vld [vmem:[%s4788_s4 + $0x1e8] sm:$0xff]  ;;  %v2865_v56 = vld [vmem:[%s4788_s4 + $0x1a0] sm:$0xff] }
 0x970   : > { %3497 = vmatmul.mubr.msk.f32.vlgmr.msra.gmra.mxu1 %vm831_vm2, %v1891_v57  ;;  %v2864_v57 = vld [vmem:[%s4788_s4 + $0x198] sm:$0xff] }
 0x971   : > { %3500 = vmatpush3.msra.mxu1 %v2823_v58  ;;  %3507 = vmatprep.mubr.msk.f32.mxu1 %vm3676_vm0, %v3675_v2  ;;  %v2863_v58 = vld [vmem:[%s4788_s4 + $0x190] sm:$0xff] }
 0x972   : > { %3501 = vmatprep.subr.mxu1 %v3675_v2 }
 0x973   : > { %3502 = vmatpush3.msra.mxu1 %v2822_v59  ;;  %v2862_v59 = vld [vmem:[%s4788_s4 + $0x188] sm:$0xff] }
 0x974   : > { %3503 = vmatprep.subr.mxu1 %v3675_v2 }
 0x975   : > { %3504 = vmatpush3.msra.mxu1 %v2821_v61  ;;  %v2861_v61 = vld [vmem:[%s4788_s4 + $0x180] sm:$0xff] }
 0x976   : > { %3505 = vmatprep.subr.mxu1 %v3675_v2 }
 0x977   : > { %3506 = vmatpush3.msra.mxu1 %v2820_v62 }
 0x978   : > { %3510 = vmatprep.subr.mxu1 %v3675_v2 }
 0xa30   : > { %v1961_v16 = vpop.f32.mrf.mxu1 }
 0xa31   : > { %3508 = vmatmul.mubr.msk.f32.vlgmr.msra.gmra.mxu1 %vm752_vm1, %v1961_v16 }
 0xa32   : > { %3511 = vmatpush3.msra.mxu1 %v2840_v15  ;;  %v3498_v34 = vpop.f32.mrf.mxu1  ;;  %3542 = vmatprep.mubr.msk.f32.mxu1 %vm3676_vm0, %v3675_v2 }
 0xa33   : > { %3512 = vmatprep.subr.mxu1 %v3675_v2  ;;  %v2884_v34 = vld [vmem:[%s4789_s5 + $0x70] sm:$0xff] }
 0xa34   : > { %3513 = vmatpush3.msra.mxu1 %v2839_v18  ;;  %v2885_v18 = vld [vmem:[%s4789_s5 + $0x78] sm:$0xff] }
 0xa35   : > { %3514 = vmatprep.subr.mxu1 %v3675_v2 }
 0xa36   : > { %3515 = vmatpush3.msra.mxu1 %v2838_v19  ;;  %v2883_v19 = vld [vmem:[%s4789_s5 + $0x68] sm:$0xff] }
 0xa37   : > { %3516 = vmatprep.subr.mxu1 %v3675_v2 }
 0xa38   : > { %3517 = vmatpush3.msra.mxu1 %v2837_v21  ;;  %v2882_v21 = vld [vmem:[%s4789_s5 + $0x60] sm:$0xff] }
 0xa39   : > { %3518 = vmatprep.subr.mxu1 %v3675_v2 }
 0xa3a   : > { %3519 = vmatpush3.msra.mxu1 %v2836_v22 }
 0xa3b   : > { %3520 = vmatprep.subr.mxu1 %v3675_v2 }
 0xa3c   : > { %3521 = vmatpush3.msra.mxu1 %v2835_v23 }
 0xa3d   : > { %3522 = vmatprep.subr.mxu1 %v3675_v2 }
 0xa3e   : > { %3523 = vmatpush3.msra.mxu1 %v2834_v24 }
 0xa3f   : > { %3524 = vmatprep.subr.mxu1 %v3675_v2 }
 0xa40   : > { %3525 = vmatpush3.msra.mxu1 %v2833_v25 }
 0xa41   : > { %3526 = vmatprep.subr.mxu1 %v3675_v2 }
 0xa42   : > { %3527 = vmatpush3.msra.mxu1 %v2832_v26 }
 0xa43   : > { %3528 = vmatprep.subr.mxu1 %v3675_v2 }
 0xa44   : > { %3529 = vmatpush3.msra.mxu1 %v2831_v27  ;;  %v2887_v27 = vld [vmem:[%s4793_s9] ss:$0 sm:$0xff] }
 0xa45   : > { %3530 = vmatprep.subr.mxu1 %v3675_v2 }
 0xa46   : > { %3531 = vmatpush3.msra.mxu1 %v2830_v28 }
 0xa47   : > { %3532 = vmatprep.subr.mxu1 %v3675_v2 }
 0xa48   : > { %3533 = vmatpush3.msra.mxu1 %v2829_v29 }
 0xa49   : > { %3534 = vmatprep.subr.mxu1 %v3675_v2 }
 0xa4a   : > { %3535 = vmatpush3.msra.mxu1 %v2828_v30 }
 0xa4b   : > { %3536 = vmatprep.subr.mxu1 %v3675_v2 }
 0xa4c   : > { %3537 = vmatpush3.msra.mxu1 %v2827_v31 }
 0xa4d   : > { %3538 = vmatprep.subr.mxu1 %v3675_v2 }
 0xa4e   : > { %3539 = vmatpush3.msra.mxu1 %v2826_v33 }
 0xa4f   : > { %3540 = vmatprep.subr.mxu1 %v3675_v2 }
 0xa50   : > { %3541 = vmatpush3.msra.mxu1 %v2825_v35 }
 0xa51   : > { %3543 = vmatmul.mubr.f32.vlgmr.msra.gmra.mxu1 %v4655_v36  ;;  %3580 = vmatprep.subr.mxu1 %v3675_v2 }
 0xa52   : > { %3612 = vmatprep.mubr.msk.f32.mxu1 %vm3676_vm0, %v3675_v2  ;;  %3581 = vmatpush3.msra.mxu1 %v2876_v20 }
 0xa53   : > { %3582 = vmatprep.subr.mxu1 %v3675_v2 }
 0xa54   : > { %3583 = vmatpush3.msra.mxu1 %v2875_v17 }
 0xa55   : > { %3584 = vmatprep.subr.mxu1 %v3675_v2 }
 0xa56   : > { %3585 = vmatpush3.msra.mxu1 %v2874_v49 }
 0xa57   : > { %3586 = vmatprep.subr.mxu1 %v3675_v2 }
 0xa58   : > { %3587 = vmatpush3.msra.mxu1 %v2873_v32 }
 0xa59   : > { %3588 = vmatprep.subr.mxu1 %v3675_v2 }
 0xa5a   : > { %3589 = vmatpush3.msra.mxu1 %v2872_v50 }
 0xa5b   : > { %3590 = vmatprep.subr.mxu1 %v3675_v2 }
 0xa5c   : > { %3591 = vmatpush3.msra.mxu1 %v2871_v51 }
 0xa5d   : > { %3592 = vmatprep.subr.mxu1 %v3675_v2 }
 0xa5e   : > { %3593 = vmatpush3.msra.mxu1 %v2870_v52 }
 0xa5f   : > { %3594 = vmatprep.subr.mxu1 %v3675_v2 }
 0xa60   : > { %3595 = vmatpush3.msra.mxu1 %v2869_v53 }
 0xa61   : > { %3596 = vmatprep.subr.mxu1 %v3675_v2 }
 0xa62   : > { %3597 = vmatpush3.msra.mxu1 %v2868_v60 }
 0xa63   : > { %3598 = vmatprep.subr.mxu1 %v3675_v2 }
 0xa64   : > { %3599 = vmatpush3.msra.mxu1 %v2867_v54 }
 0xa65   : > { %3600 = vmatprep.subr.mxu1 %v3675_v2 }
 0xa66   : > { %3601 = vmatpush3.msra.mxu1 %v2866_v55 }
 0xa67   : > { %3602 = vmatprep.subr.mxu1 %v3675_v2 }
 0xa68   : > { %3603 = vmatpush3.msra.mxu1 %v2865_v56 }
 0xa69   : > { %3604 = vmatprep.subr.mxu1 %v3675_v2 }
 0xa6a   : > { %3605 = vmatpush3.msra.mxu1 %v2864_v57 }
 0xa6b   : > { %3606 = vmatprep.subr.mxu1 %v3675_v2 }
 0xa6c   : > { %3607 = vmatpush3.msra.mxu1 %v2863_v58 }
 0xa6d   : > { %3608 = vmatprep.subr.mxu1 %v3675_v2 }
 0xa6e   : > { %3609 = vmatpush3.msra.mxu1 %v2862_v59 }
 0xa6f   : > { %3610 = vmatprep.subr.mxu1 %v3675_v2 }
 0xa70   : > { %3611 = vmatpush3.msra.mxu1 %v2861_v61 }
 0xa71   : > { %3613 = vmatmul.mubr.f32.vlgmr.msra.gmra.mxu1 %v4582_v14 }
 0xaf1   : > { %v2039_v42 = vpop.f32.mrf.mxu1 }
 0xaf2   : > { %v4668_v43 = vadd.f32 %v2039_v42, %v1515_v41 }
 0xaf3   : > { %v3509_v44 = vpop.f32.mrf.mxu1 }
 0xb11   : > { %v2135_v46 = vpop.f32.mrf.mxu1 }
 0xb12   : > { %v2136_v47 = vadd.f32 %v2842_v45, %v2135_v46 }
 0xb13   : > { %v3544_v48 = vpop.f32.mrf.mxu1 }
 0xb14   : > { %3618 = vmatmul.mubr.msk.f32.vlgmr.msra.gmra.mxu0 %vm752_vm1, %v2136_v47 }
 0xb15   : > { %3622 = vmatprep.mubr.msk.f32.mxu0 %vm3676_vm0, %v3675_v2 }
 0xb31   : > { %v2325_v11 = vpop.f32.mrf.mxu1 }
 0xb32   : > { %v2326_v12 = vadd.f32 %v2878_v10, %v2325_v11 }
 0xb33   : > { %v3614_v13 = vpop.f32.mrf.mxu1 }
 0xb34   : > { %3621 = vmatpush3.msra.mxu0 %v2326_v12 }
 0xb35   : > { %3625 = vmatprep.subr.mxu0 %v3675_v2 }
 0xbd4   : > { %v2401_v62 = vpop.f32.mrf.mxu0 }
 0xbd5   : > { %v2405_v63 = vmul.f32 0.17677669, %v2401_v62 }
 0xbd6   : > { %v3619_v0 = vpop.f32.mrf.mxu0 }
 0xbd7   : > { %v2406_v3 = vadd.f32 %v3666_v1, %v2405_v63 }
 0xbd9   : > { %v2407_v4 = vsel %vm831_vm2, %v2406_v3, -inf }
 0xbda   : > { %2408 = vmax.xlane.f32.xlu0 %v2407_v4 }
 0xc63   : > { %v2409_v5 = vpop.xlane.xlu0 %2408 }
 0xc64   : > { %v2410_v6 = vsub.f32 %v2406_v3, %v2409_v5 }
 0xc66   : > { %v2411_v7 = vmul.f32 1.442695, %v2410_v6 }
 0xc68   : > { %3658 = vpow2.f32 %v2411_v7 }
 0xc75   : > { %v3659_v8 = vpop.eup %3658 }
 0xc76   : > { %v2413_v9 = vsel %vm831_vm2, %v3659_v8, 0.0 }
 0xc77   : > { %2414 = vadd.xlane.f32.xlu1 %v2413_v9 }
 0xd00   : > { %v2415_v14 = vpop.xlane.xlu1 %2414 }
 0xd01   : > { %3660 = vrcp.f32 %v2415_v14 }
 0xd0e   : > { %v3661_v15 = vpop.eup %3660 }
 0xd0f   : > { %v2417_v16 = vmul.f32 %v3661_v15, %v3659_v8 }
 0xd11   : > { %3623 = vmatmul.mubr.msk.f32.vlgmr.msra.gmra.mxu0 %vm831_vm2, %v2417_v16 }
 0xd12   : > { %3626 = vmatpush3.msra.mxu0 %v2885_v18  ;;  %3633 = vmatprep.mubr.msk.f32.mxu0 %vm3676_vm0, %v3675_v2 }
 0xd13   : > { %3627 = vmatprep.subr.mxu0 %v3675_v2 }
 0xd14   : > { %3628 = vmatpush3.msra.mxu0 %v2884_v34 }
 0xd15   : > { %3629 = vmatprep.subr.mxu0 %v3675_v2 }
 0xd16   : > { %3630 = vmatpush3.msra.mxu0 %v2883_v19 }
 0xd17   : > { %3631 = vmatprep.subr.mxu0 %v3675_v2 }
 0xd18   : > { %3632 = vmatpush3.msra.mxu0 %v2882_v21 }
 0xdd1   : > { %v2487_v22 = vpop.f32.mrf.mxu0 }
 0xdd2   : > { %3634 = vmatmul.mubr.msk.f32.vlgmr.msra.gmra.mxu0 %vm752_vm1, %v2487_v22 }
 0xdd3   : > { %v3624_v23 = vpop.f32.mrf.mxu0 }
 0xe92   : > { %v2565_v24 = vpop.f32.mrf.mxu0 }
 0xe93   : > { %v2569_v25 = vadd.f32 %v2565_v24, %v4668_v43 }
 0xe94   : > { %v3635_v26 = vpop.f32.mrf.mxu0 }
 0xe95   : > { %v2570_v28 = vadd.f32 %v4655_v36, %v2569_v25  ;;  %v2889_v36 = vld [vmem:[%s4796_s12] ss:$0 sm:$0xff] }
 0xe97   : > { %v2578_v2 = vadd.f32 %v2887_v27, %v2570_v28 }
 0xe99   : > { %2579 = vadd.xlane.f32.xlu0 %v2578_v2 }
 0xf22   : > { %v2580_v29 = vpop.xlane.xlu0 %2579 }
 0xf23   : > { %v2582_v30 = vmul.f32 0.0078125, %v2580_v29 }
 0xf25   : > { %v2583_v31 = vsub.f32 %v2578_v2, %v2582_v30 }
 0xf27   : > { %v2584_v33 = vmul.f32 %v2583_v31, %v2583_v31 }
 0xf29   : > { %2585 = vadd.xlane.f32.xlu1 %v2584_v33 }
 0xfb2   : > { %v2586_v35 = vpop.xlane.xlu1 %2585 }
 0xfb3   : > { %v2587_v37 = vmul.f32 0.0078125, %v2586_v35 }
 0xfb5   : > { %v2588_v38 = vadd.f32 1e-05, %v2587_v37 }
 0xfb7   : > { %3662 = vrsqrt.f32 %v2588_v38 }
 0xfc4   : > { %v3663_v39 = vpop.eup %3662 }
 0xfc5   : > { %v2590_v41 = vmul.f32 %v3663_v39, %v2583_v31 }
 0xfc7   : > { %v2598_v42 = vmul.f32 %v2888_v40, %v2590_v41 }
 0xfc9   : > { %v2606_v43 = vadd.f32 %v2889_v36, %v2598_v42 }
 0xfcb   : > { %2607 = vst [vmem:[%s469_s21] sm:$0xff] %v2606_v43 }
 0xfcc PF: > { %s23_s25 = sadd.s32 1, %s3673_s25  }
 0xfcd   : > { %p20_p4 = scmp.ge.s32.totalorder %s23_s25, 4  }
 0xfcf   :  { %22 = sbr.rel (!%p20_p4) target bundleno = 1 (0x1), region = 129 }

</bundles_post_ra>
